<compile_context>
chip_gen: v6e
topology: v6e:2x2x1
jax: 0.10.0
libtpu: 0.0.40
codegen_flags: <defaults>
</compile_context>

<pallas_src>
import jax
import jax.numpy as jnp
from jax.experimental import pallas as pl
from jax.experimental.pallas import tpu as pltpu

STATE_SIZE = 4      # CartPole-v1 observation dim
H1 = 256
H2 = 128
ACTION_SIZE = 2     # CartPole-v1 action dim
NPAD = 128          # lane-padded logits / probs width (lane-dense output)
K1PAD = 16          # fc1 contraction padded to one bf16 sublane tile
TB_MAX = 512        # max batch tile (single grid step for B <= 512)

# Packed bf16 weight slab layout: every region start is a multiple of 16
# (bf16 packs (16,128) per vreg) so in-kernel slices are zero-cost views.
_W1_R0 = 0                    # rows   0:16  -> w1 (4,256)  zero-padded to (16,256)
_W2_R0 = 16                   # rows  16:272 -> w2 (256,128) in lanes 0:128
_W2_R1 = _W2_R0 + H1
_W3_R0 = _W2_R1               # rows 272:400 -> w3 (128,2)  zero-padded to (128,128)
_W3_R1 = _W3_R0 + H2
_WP_ROWS = _W3_R1             # 400 (multiple of 16)
_WP_COLS = H1                 # 256


def actor_kernel(x_ref, wp_ref, bp_ref, o_ref):
    # x_ref: (tb, 16) f32, lanes 4:16 are zero padding.
    x = x_ref[...].astype(jnp.bfloat16)

    # ---- fc1 + ReLU: degenerate K=16 bf16 MXU dot (w1 rows 4:16 are zero) ----
    h1 = jnp.dot(x, wp_ref[_W1_R0:_W2_R0, :], preferred_element_type=jnp.float32)
    h1 = jnp.maximum(h1 + bp_ref[0:1, :], 0.0)                          # (tb, 256) f32

    # ---- fc2 + ReLU: bf16 operands straight from the resident slab ----
    h2 = jnp.dot(h1.astype(jnp.bfloat16), wp_ref[_W2_R0:_W2_R1, 0:H2],
                 preferred_element_type=jnp.float32)
    h2 = jnp.maximum(h2 + bp_ref[1:2, 0:H2], 0.0)                       # (tb, 128) f32

    # ---- fc3 into a lane-dense 128-wide slab (w3 cols >= 2 are zero) ----
    logits = jnp.dot(h2.astype(jnp.bfloat16), wp_ref[_W3_R0:_W3_R1, 0:NPAD],
                     preferred_element_type=jnp.float32)
    logits = logits + bp_ref[2:3, 0:NPAD]          # f32 bias; padded lanes get -1e30

    # ---- numerically-stable softmax over the padded lane dim ----
    m = jnp.max(logits, axis=-1, keepdims=True)
    e = jnp.exp(logits - m)                        # padded lanes -> exp(-huge) = 0
    s = jnp.sum(e, axis=-1, keepdims=True)
    o_ref[...] = e / s                             # exact divide (rows sum to 1)


def pack_params(params):
    """Pack the 6 PyTorch-style tensors into one bf16 weight slab + one f32 bias slab."""
    w1, b1 = params["w1"], params["b1"].reshape(-1)
    w2, b2 = params["w2"], params["b2"].reshape(-1)
    w3, b3 = params["w3"], params["b3"].reshape(-1)

    wp = jnp.zeros((_WP_ROWS, _WP_COLS), jnp.float32)
    wp = wp.at[0:STATE_SIZE, 0:H1].set(w1)
    wp = wp.at[_W2_R0:_W2_R1, 0:H2].set(w2)
    wp = wp.at[_W3_R0:_W3_R1, 0:ACTION_SIZE].set(w3)
    wp = wp.astype(jnp.bfloat16)                   # ~200 KiB resident bf16 slab

    bp = jnp.zeros((8, _WP_COLS), jnp.float32)     # biases stay f32 (keeps -1e30 trick exact)
    bp = bp.at[0, 0:H1].set(b1)
    bp = bp.at[1, 0:H2].set(b2)
    bp = bp.at[2, 0:NPAD].set(jnp.full((NPAD,), -1e30, jnp.float32))  # kill padded logits
    bp = bp.at[2, 0:ACTION_SIZE].set(b3)
    return wp, bp


def actor_forward(x, wp, bp):
    """x: (B, 4) f32. wp/bp: packed params from pack_params(). Returns (B, 2) probs."""
    B = x.shape[0]
    tb = pl.cdiv(min(B, TB_MAX), 8) * 8            # sublane-aligned batch tile (single step for B<=512)
    Bp = pl.cdiv(B, tb) * tb
    # Pad batch to the tile and the feature dim to K1PAD lanes (zeros -> no effect on fc1).
    x = jnp.pad(x, ((0, Bp - B), (0, K1PAD - STATE_SIZE)))

    out = pl.pallas_call(
        actor_kernel,
        out_shape=jax.ShapeDtypeStruct((Bp, NPAD), jnp.float32),
        grid=(Bp // tb,),
        in_specs=[
            pl.BlockSpec((tb, K1PAD), lambda i: (i, 0)),               # batch-tiled activations
            pl.BlockSpec((_WP_ROWS, _WP_COLS), lambda i: (0, 0)),      # bf16 weights, resident
            pl.BlockSpec((8, _WP_COLS), lambda i: (0, 0)),             # f32 biases, resident
        ],
        out_specs=pl.BlockSpec((tb, NPAD), lambda i: (i, 0)),          # lane-dense output slab
        compiler_params=pltpu.CompilerParams(
            dimension_semantics=("parallel",)),
    )(x, wp, bp)
    return out[:B, :ACTION_SIZE]


def init_params(key, state_size, action_size):
    """Mimics PyTorch nn.Linear default init (U[-1/sqrt(fan_in), +1/sqrt(fan_in)])."""
    def linear(k, fan_in, fan_out):
        kw, kb = jax.random.split(k)
        bound = 1.0 / jnp.sqrt(jnp.float32(fan_in))
        w = jax.random.uniform(kw, (fan_in, fan_out), jnp.float32, -bound, bound)
        b = jax.random.uniform(kb, (fan_out,), jnp.float32, -bound, bound)
        return w, b

    k1, k2, k3 = jax.random.split(key, 3)
    w1, b1 = linear(k1, state_size, H1)
    w2, b2 = linear(k2, H1, H2)
    w3, b3 = linear(k3, H2, action_size)
    return {"w1": w1, "b1": b1, "w2": w2, "b2": b2, "w3": w3, "b3": b3}


def actor_reference(x, params):
    """Pure-JAX reference mirroring the kernel's bf16-operand / f32-accumulate dots."""
    bf = lambda a: a.astype(jnp.bfloat16)
    h1 = jnp.maximum(
        jnp.dot(bf(x), bf(params["w1"]), preferred_element_type=jnp.float32)
        + params["b1"], 0.0)
    h2 = jnp.maximum(
        jnp.dot(bf(h1), bf(params["w2"]), preferred_element_type=jnp.float32)
        + params["b2"], 0.0)
    logits = jnp.dot(bf(h2), bf(params["w3"]),
                     preferred_element_type=jnp.float32) + params["b3"]
    return jax.nn.softmax(logits, axis=-1)


if __name__ == "__main__":
    key = jax.random.PRNGKey(0)
    k_x, k_p = jax.random.split(key)

    batch = 256   # amortize dispatch/DMA overhead across many environment states
    x = jax.random.normal(k_x, (batch, STATE_SIZE), jnp.float32)
    params = init_params(k_p, STATE_SIZE, ACTION_SIZE)
    wp, bp = pack_params(params)   # done once, reused across rollout steps

    probs = actor_forward(x, wp, bp)
    probs = jax.block_until_ready(probs)

    ref = actor_reference(x, params)
    assert probs.shape == (batch, ACTION_SIZE)
    assert jnp.allclose(probs, ref, atol=2e-3), "mismatch vs reference"
    assert jnp.allclose(jnp.sum(probs, axis=-1), 1.0, atol=2e-3), "softmax rows must sum to ~1"

    print("KERNEL_OK")
</pallas_src>

<mosaic_0001>
module attributes {stable_mosaic.version = 11 : i64} {
  func.func @actor_kernel(%arg0: i32, %arg1: memref<256x16xf32, #tpu.memory_space<vmem>>, %arg2: memref<400x256xbf16, #tpu.memory_space<vmem>>, %arg3: memref<8x256xf32, #tpu.memory_space<vmem>>, %arg4: memref<256x128xf32, #tpu.memory_space<vmem>>) attributes {dimension_semantics = [#tpu.dimension_semantics<parallel>], iteration_bounds = array<i64: 1>, scalar_prefetch = 0 : i64, scratch_operands = 0 : i64, tpu.core_type = #tpu.core_type<tc>, window_params = [{transform_indices = @transform_0, window_bounds = array<i64: 256, 16>}, {pipeline_mode = #tpu.pipeline_mode<synchronous>, transform_indices = @transform_1, window_bounds = array<i64: 400, 256>}, {pipeline_mode = #tpu.pipeline_mode<synchronous>, transform_indices = @transform_2, window_bounds = array<i64: 8, 256>}, {transform_indices = @transform_3, window_bounds = array<i64: 256, 128>}]} {
    %c0 = arith.constant 0 : index
    %c0_0 = arith.constant 0 : index
    %0 = vector.load %arg1[%c0, %c0_0] : memref<256x16xf32, #tpu.memory_space<vmem>>, vector<256x16xf32>
    %1 = arith.truncf %0 : vector<256x16xf32> to vector<256x16xbf16>
    %c0_1 = arith.constant 0 : index
    %c0_2 = arith.constant 0 : index
    %2 = vector.load %arg2[%c0_1, %c0_2] : memref<400x256xbf16, #tpu.memory_space<vmem>>, vector<16x256xbf16>
    %cst = arith.constant dense<0.000000e+00> : vector<256x256xf32>
    %3 = tpu.matmul %1, %2, %cst {dimension_numbers = #tpu.dot_dimension_numbers<[1], [0], [0], [1], [0, 0, 1, 1], [], []>} : vector<256x16xbf16>, vector<16x256xbf16>, vector<256x256xf32> -> vector<256x256xf32>
    %c0_3 = arith.constant 0 : index
    %c0_4 = arith.constant 0 : index
    %4 = vector.load %arg3[%c0_3, %c0_4] : memref<8x256xf32, #tpu.memory_space<vmem>>, vector<1x256xf32>
    %5 = vector.broadcast %4 : vector<1x256xf32> to vector<256x256xf32>
    %6 = arith.addf %3, %5 : vector<256x256xf32>
    %cst_5 = arith.constant 0.000000e+00 : f32
    %7 = vector.broadcast %cst_5 : f32 to vector<256x256xf32>
    %8 = arith.maximumf %6, %7 : vector<256x256xf32>
    %9 = arith.truncf %8 : vector<256x256xf32> to vector<256x256xbf16>
    %c16 = arith.constant 16 : index
    %c0_6 = arith.constant 0 : index
    %10 = vector.load %arg2[%c16, %c0_6] : memref<400x256xbf16, #tpu.memory_space<vmem>>, vector<256x128xbf16>
    %cst_7 = arith.constant dense<0.000000e+00> : vector<256x128xf32>
    %11 = tpu.matmul %9, %10, %cst_7 {dimension_numbers = #tpu.dot_dimension_numbers<[1], [0], [0], [1], [0, 0, 1, 1], [], []>} : vector<256x256xbf16>, vector<256x128xbf16>, vector<256x128xf32> -> vector<256x128xf32>
    %c1 = arith.constant 1 : index
    %c0_8 = arith.constant 0 : index
    %12 = vector.load %arg3[%c1, %c0_8] : memref<8x256xf32, #tpu.memory_space<vmem>>, vector<1x128xf32>
    %13 = vector.broadcast %12 : vector<1x128xf32> to vector<256x128xf32>
    %14 = arith.addf %11, %13 : vector<256x128xf32>
    %cst_9 = arith.constant 0.000000e+00 : f32
    %15 = vector.broadcast %cst_9 : f32 to vector<256x128xf32>
    %16 = arith.maximumf %14, %15 : vector<256x128xf32>
    %17 = arith.truncf %16 : vector<256x128xf32> to vector<256x128xbf16>
    %c272 = arith.constant 272 : index
    %c0_10 = arith.constant 0 : index
    %18 = vector.load %arg2[%c272, %c0_10] : memref<400x256xbf16, #tpu.memory_space<vmem>>, vector<128x128xbf16>
    %cst_11 = arith.constant dense<0.000000e+00> : vector<256x128xf32>
    %19 = tpu.matmul %17, %18, %cst_11 {dimension_numbers = #tpu.dot_dimension_numbers<[1], [0], [0], [1], [0, 0, 1, 1], [], []>} : vector<256x128xbf16>, vector<128x128xbf16>, vector<256x128xf32> -> vector<256x128xf32>
    %c2 = arith.constant 2 : index
    %c0_12 = arith.constant 0 : index
    %20 = vector.load %arg3[%c2, %c0_12] : memref<8x256xf32, #tpu.memory_space<vmem>>, vector<1x128xf32>
    %21 = vector.broadcast %20 : vector<1x128xf32> to vector<256x128xf32>
    %22 = arith.addf %19, %21 : vector<256x128xf32>
    %cst_13 = arith.constant dense<0xFF800000> : vector<256xf32>
    %23 = vector.multi_reduction <maximumf>, %22, %cst_13 [1] : vector<256x128xf32> to vector<256xf32>
    %24 = vector.shape_cast %23 : vector<256xf32> to vector<256x1xf32>
    %25 = vector.broadcast %24 : vector<256x1xf32> to vector<256x128xf32>
    %26 = arith.subf %22, %25 : vector<256x128xf32>
    %27 = math.exp %26 : vector<256x128xf32>
    %cst_14 = arith.constant dense<0.000000e+00> : vector<256xf32>
    %28 = vector.multi_reduction <add>, %27, %cst_14 [1] : vector<256x128xf32> to vector<256xf32>
    %29 = vector.shape_cast %28 : vector<256xf32> to vector<256x1xf32>
    %30 = vector.broadcast %29 : vector<256x1xf32> to vector<256x128xf32>
    %31 = arith.divf %27, %30 : vector<256x128xf32>
    %c0_15 = arith.constant 0 : index
    %c0_16 = arith.constant 0 : index
    %32 = vector.load %arg4[%c0_15, %c0_16] : memref<256x128xf32, #tpu.memory_space<vmem>>, vector<256x128xf32>
    tpu.vector_store %arg4[%c0_15, %c0_16], %31 {strides = array<i32>} : memref<256x128xf32, #tpu.memory_space<vmem>>, vector<256x128xf32>,
    return
  }
  func.func @transform_0(%arg0: i32) -> (i32, i32) {
    %c0_i32 = arith.constant 0 : i32
    %c0_i32_0 = arith.constant 0 : i32
    return %arg0, %c0_i32 : i32, i32
  }
  func.func @transform_1(%arg0: i32) -> (i32, i32) {
    %c0_i32 = arith.constant 0 : i32
    %c0_i32_0 = arith.constant 0 : i32
    %c0_i32_1 = arith.constant 0 : i32
    return %c0_i32, %c0_i32_0 : i32, i32
  }
  func.func @transform_2(%arg0: i32) -> (i32, i32) {
    %c0_i32 = arith.constant 0 : i32
    %c0_i32_0 = arith.constant 0 : i32
    %c0_i32_1 = arith.constant 0 : i32
    return %c0_i32, %c0_i32_0 : i32, i32
  }
  func.func @transform_3(%arg0: i32) -> (i32, i32) {
    %c0_i32 = arith.constant 0 : i32
    %c0_i32_0 = arith.constant 0 : i32
    return %arg0, %c0_i32 : i32, i32
  }
}

</mosaic_0001>

<bundles_post_ra>
// kernel: tpu_custom_call.1
= control target key start
LH: loop header
LB: loop body
LE: loop exit
PB: predicated region body
PF: predicated region fallthrough
CT: control target
= control target key end

     0   :  { %8 = vsyncpa [#allocation3], 0  ;;  %s2363_s0 = inlined_call_operand.vmem [shape: f32[256,16], index: 0, kind: input, shape index: {}]   ;;  %s2364_s1 = inlined_call_operand.hbm [shape: bf16[400,256], index: 1, kind: input, shape index: {}]   ;;  %s2365_s2 = inlined_call_operand.vmem [shape: f32[8,256], index: 2, kind: input, shape index: {}]   ;;  %s2366_s3 = inlined_call_operand.hbm [shape: f32[256,128], index: 3, kind: output, shape index: {}]  }
   0x1   :  { %9 = vsyncpa [#allocation4], 0  ;;  %s1773_s12 = smov [#allocation2]  }
   0x2   :  { %s17_s13 = sshll.u32 %s1773_s12, 4  ;;  %s18_s13 = int_to_ptr.vmem [resolvable:$true] %s17_s13 }
   0x3   :  { %s1737_s14 = scalar_lea.vmem %s18_s13, 6400  ;;  %p1742_p1 = scmp.lt.s32.totalorder %s18_s13, %s18_s13 }
   0x4   :  { %p1738_p0 = scmp.ne.s32.totalorder %s18_s13, %s1737_s14  ;;  %p1743_p2 = scmp.lt.s32.totalorder %s1737_s14, %s1737_s14 }
   0x6   :  { %p1744_p3 = por %p1743_p2, %p1742_p1 }
   0x8   :  { %p1745_p4 = pnand %p1744_p3, %p1738_p0 }
   0xa   :  { %1748 = shalt.err (!%p1745_p4)
}
   0xb   :  { %s1774_s15 = smov 128   ;;  %s1775_s16 = smov 8  }
   0xc   :  { %23 = dma.hbm_to_vmem [thread:$0]  %s2364_s1, 6400, %s18_s13, [#allocation3], %s1774_s15, %s1774_s15, %s1775_s16  }
   0xd   :  { %1769 = dma.done.wait [#allocation3], 6400  }
   0xe   :  { %1770 = vsyncadd [#allocation3], 4294960896  ;;  %v1776_v0 = vmov 0   ;;  %v1574_v1 = vld [vmem:[#allocation2 + $0x4] ss:$8 sps:$4 sm:$0xff]   ;;  %vm102_vm0 = vcmask 130048  }
   0xf   :  { %183 = vmatprep.mubr.bf16.mxu0 %v1776_v0  ;;  %303 = vmatprep.mubr.bf16.mxu1 %v1776_v0  ;;  %v1576_v2 = vld [vmem:[#allocation2] ss:$8 sps:$4 sm:$0xff]   ;;  %v32_v6 = vld [vmem:[%s2363_s0 + $0x10] sm:$0xff]  ;;  %v33_v7 = vld [vmem:[%s2363_s0 + $0x18] sm:$0xff] }
  0x10   :  { %v30_v3 = vld [vmem:[%s2363_s0] sm:$0xff]  ;;  %v31_v4 = vld [vmem:[%s2363_s0 + $0x8] sm:$0xff]  ;;  %165 = vmatprep.subr.bf16.mxu0 %v1574_v1  ;;  %1567 = vmatprep.subr.bf16.mxu1 %v1574_v1  ;;  %v63_v10 = vpack.c.bf16 %v33_v7, %v32_v6  ;;  %v56_v12 = vld [vmem:[%s2363_s0 + $0xd0] sm:$0xff] }
  0x11   :  { %v62_v5 = vpack.c.bf16 %v31_v4, %v30_v3  ;;  %166 = vmatpush1.bf16.msra.mxu0 %v1576_v2  ;;  %1568 = vmatpush1.bf16.msra.mxu1 %v1576_v2  ;;  %v54_v8 = vld [vmem:[%s2363_s0 + $0xc0] sm:$0xff]  ;;  %v55_v9 = vld [vmem:[%s2363_s0 + $0xc8] sm:$0xff]  ;;  %v57_v13 = vld [vmem:[%s2363_s0 + $0xd8] sm:$0xff]  ;;  %v82_v4 = vlaneseq }
  0x12   :  { %v74_v11 = vpack.c.bf16 %v55_v9, %v54_v8  ;;  %v1577_v14 = vld [vmem:[#allocation2 + $0x100] ss:$8 sps:$4 sm:$0xff]   ;;  %v1579_v18 = vld [vmem:[#allocation2 + $0xf0] ss:$8 sps:$4 sm:$0xff]   ;;  %v75_v20 = vpack.c.bf16 %v57_v13, %v56_v12 }
  0x13   :  { %v34_v15 = vld [vmem:[%s2363_s0 + $0x20] sm:$0xff]  ;;  %v35_v16 = vld [vmem:[%s2363_s0 + $0x28] sm:$0xff]  ;;  %1383 = vmatprep.subr.bf16.mxu1 %v1577_v14  ;;  %v1580_v19 = vld [vmem:[#allocation2 + $0x70] ss:$8 sps:$4 sm:$0xff]  }
  0x14   :  { %1343 = vmatmul.mubr.msk.bf16.vlgmr.msra.gmra.mxu0 %vm102_vm0, %v62_v5  ;;  %1355 = vmatmul.mubr.msk.bf16.vlgmr.msra.gmra.mxu1 %vm102_vm0, %v74_v11  ;;  %v1578_v17 = vld [vmem:[#allocation2 + $0x80] ss:$8 sps:$4 sm:$0xff]   ;;  %v64_v22 = vpack.c.bf16 %v35_v16, %v34_v15  ;;  %v1583_v25 = vld [vmem:[#allocation2 + $0xd0] ss:$8 sps:$4 sm:$0xff]   ;;  %v83_v5 = vshrl.u32 %v82_v4, 7 }
  0x15   :  { %193 = vmatprep.mubr.bf16.mxu0 %v1776_v0  ;;  %313 = vmatprep.mubr.bf16.mxu1 %v1776_v0  ;;  %v1581_v21 = vld [vmem:[#allocation2 + $0xe0] ss:$8 sps:$4 sm:$0xff]   ;;  %v36_v26 = vld [vmem:[%s2363_s0 + $0x30] sm:$0xff]  ;;  %v37_v27 = vld [vmem:[%s2363_s0 + $0x38] sm:$0xff] }
  0x16   :  { %1384 = vmatpush3.bf16.msra.mxu1 %v1578_v17  ;;  %v58_v23 = vld [vmem:[%s2363_s0 + $0xe0] sm:$0xff]  ;;  %v59_v28 = vld [vmem:[%s2363_s0 + $0xe8] sm:$0xff]  ;;  %v1584_v29 = vld [vmem:[#allocation2 + $0x50] ss:$8 sps:$4 sm:$0xff]   ;;  %v65_v33 = vpack.c.bf16 %v37_v27, %v36_v26  ;;  %v88_v6 = vsub.s32 1, %v83_v5  ;;  %v84_v7 = vsub.s32 0, %v83_v5 }
  0x17   :  { %1385 = vmatprep.subr.bf16.mxu1 %v1579_v18  ;;  %v1582_v24 = vld [vmem:[#allocation2 + $0x60] ss:$8 sps:$4 sm:$0xff]   ;;  %v76_v31 = vpack.c.bf16 %v59_v28, %v58_v23  ;;  %v60_v34 = vld [vmem:[%s2363_s0 + $0xf0] sm:$0xff]  ;;  %v61_v35 = vld [vmem:[%s2363_s0 + $0xf8] sm:$0xff] }
  0x18   :  { %v1585_v30 = vld [vmem:[#allocation2 + $0xc0] ss:$8 sps:$4 sm:$0xff]   ;;  %v77_v38 = vpack.c.bf16 %v61_v35, %v60_v34  ;;  %v40_v40 = vld [vmem:[%s2363_s0 + $0x50] sm:$0xff]  ;;  %v41_v41 = vld [vmem:[%s2363_s0 + $0x58] sm:$0xff] }
  0x19   :  { %v1586_v32 = vld [vmem:[#allocation2 + $0x40] ss:$8 sps:$4 sm:$0xff]   ;;  %v67_v42 = vpack.c.bf16 %v41_v41, %v40_v40  ;;  %v44_v46 = vld [vmem:[%s2363_s0 + $0x70] sm:$0xff]  ;;  %v45_v47 = vld [vmem:[%s2363_s0 + $0x78] sm:$0xff] }
  0x1a   :  { %1386 = vmatpush3.bf16.msra.mxu1 %v1580_v19  ;;  %v38_v36 = vld [vmem:[%s2363_s0 + $0x40] sm:$0xff]  ;;  %v39_v37 = vld [vmem:[%s2363_s0 + $0x48] sm:$0xff]  ;;  %v69_v48 = vpack.c.bf16 %v45_v47, %v44_v46  ;;  %v1587_v52 = vld [vmem:[#allocation2 + $0xb0] ss:$8 sps:$4 sm:$0xff]  }
  0x1b   :  { %1387 = vmatprep.subr.bf16.mxu1 %v1581_v21  ;;  %v66_v39 = vpack.c.bf16 %v39_v37, %v38_v36  ;;  %v42_v43 = vld [vmem:[%s2363_s0 + $0x60] sm:$0xff]  ;;  %v43_v44 = vld [vmem:[%s2363_s0 + $0x68] sm:$0xff]  ;;  %v48_v53 = vld [vmem:[%s2363_s0 + $0x90] sm:$0xff] }
  0x1c   :  { %1344 = vmatmul.mubr.msk.bf16.gmra.mxu0 %vm102_vm0, %v63_v10  ;;  %1356 = vmatmul.mubr.msk.bf16.gmra.mxu1 %vm102_vm0, %v75_v20  ;;  %v68_v45 = vpack.c.bf16 %v43_v44, %v42_v43  ;;  %v46_v49 = vld [vmem:[%s2363_s0 + $0x80] sm:$0xff]  ;;  %v47_v50 = vld [vmem:[%s2363_s0 + $0x88] sm:$0xff]  ;;  %v49_v54 = vld [vmem:[%s2363_s0 + $0x98] sm:$0xff] }
  0x1d   :  { %203 = vmatprep.mubr.bf16.mxu0 %v1776_v0  ;;  %323 = vmatprep.mubr.bf16.mxu1 %v1776_v0  ;;  %v70_v51 = vpack.c.bf16 %v47_v50, %v46_v49  ;;  %v1588_v55 = vld [vmem:[#allocation2 + $0x30] ss:$8 sps:$4 sm:$0xff]   ;;  %v71_v56 = vpack.c.bf16 %v49_v54, %v48_v53  ;;  %v1589_v57 = vld [vmem:[#allocation2 + $0xa0] ss:$8 sps:$4 sm:$0xff]  }
  0x1e   :  { %1388 = vmatpush3.bf16.msra.mxu1 %v1582_v24  ;;  %v1590_v58 = vld [vmem:[#allocation2 + $0x20] ss:$8 sps:$4 sm:$0xff]   ;;  %v1591_v59 = vld [vmem:[#allocation2 + $0x90] ss:$8 sps:$4 sm:$0xff]  }
  0x1f   :  { %1389 = vmatprep.subr.bf16.mxu1 %v1583_v25  ;;  %v50_v60 = vld [vmem:[%s2363_s0 + $0xa0] sm:$0xff]  ;;  %v51_v61 = vld [vmem:[%s2363_s0 + $0xa8] sm:$0xff]  ;;  %v1592_v62 = vld [vmem:[#allocation2 + $0x10] ss:$8 sps:$4 sm:$0xff]  }
  0x20   :  { %v72_v63 = vpack.c.bf16 %v51_v61, %v50_v60  ;;  %v52_v1 = vld [vmem:[%s2363_s0 + $0xb0] sm:$0xff]  ;;  %v53_v2 = vld [vmem:[%s2363_s0 + $0xb8] sm:$0xff]  ;;  %v80_v8 = vld [vmem:[%s2365_s2] ss:$8 sm:$0x3] }
  0x21   :  { %v73_v3 = vpack.c.bf16 %v53_v2, %v52_v1  ;;  %v1935_v9 = vrot.slane %v80_v8, %v88_v6  ;;  %v1937_v10 = vrot.slane %v80_v8, %v84_v7  ;;  %v1593_v17 = vld [vmem:[#allocation2 + $0x180] ss:$8 sps:$4 sm:$0xff]   ;;  %v1594_v18 = vld [vmem:[#allocation2 + $0x170] ss:$8 sps:$4 sm:$0xff]  }
  0x22   :  { %1390 = vmatpush3.bf16.msra.mxu1 %v1584_v29  ;;  %1519 = vmatprep.subr.bf16.mxu0 %v1593_v17  ;;  %v1595_v26 = vld [vmem:[#allocation2 + $0x160] ss:$8 sps:$4 sm:$0xff]  }
  0x23   :  { %1391 = vmatprep.subr.bf16.mxu1 %v1585_v30  ;;  %1520 = vmatpush3.bf16.msra.mxu0 %v1593_v17 }
  0x24   :  { %1345 = vmatmul.mubr.msk.bf16.gmra.mxu0 %vm102_vm0, %v64_v22  ;;  %1357 = vmatmul.mubr.msk.bf16.gmra.mxu1 %vm102_vm0, %v76_v31 }
  0x25   :  { %213 = vmatprep.mubr.bf16.mxu0 %v1776_v0  ;;  %333 = vmatprep.mubr.bf16.mxu1 %v1776_v0 }
  0x26   :  { %1392 = vmatpush3.bf16.msra.mxu1 %v1586_v32  ;;  %1521 = vmatprep.subr.bf16.mxu0 %v1594_v18 }
  0x27   :  { %1393 = vmatprep.subr.bf16.mxu1 %v1587_v52  ;;  %1522 = vmatpush3.bf16.msra.mxu0 %v1594_v18 }
  0x28   :  { %1523 = vmatprep.subr.bf16.mxu0 %v1595_v26 }
  0x2a   :  { %1394 = vmatpush3.bf16.msra.mxu1 %v1588_v55 }
  0x2b   :  { %1395 = vmatprep.subr.bf16.mxu1 %v1589_v57  ;;  %1524 = vmatpush3.bf16.msra.mxu0 %v1595_v26 }
  0x2c   :  { %1346 = vmatmul.mubr.msk.bf16.gmra.mxu0 %vm102_vm0, %v65_v33  ;;  %1358 = vmatmul.mubr.msk.bf16.gmra.mxu1 %vm102_vm0, %v77_v38 }
  0x2d   :  { %223 = vmatprep.mubr.bf16.mxu0 %v1776_v0 }
  0x2e   :  { %1396 = vmatpush3.bf16.msra.mxu1 %v1590_v58 }
  0x2f   :  { %1397 = vmatprep.subr.bf16.mxu1 %v1591_v59 }
  0x32   :  { %1398 = vmatpush3.bf16.msra.mxu1 %v1592_v62 }
  0x34   :  { %1347 = vmatmul.mubr.msk.bf16.gmra.mxu0 %vm102_vm0, %v66_v39 }
  0x35   :  { %233 = vmatprep.mubr.bf16.mxu0 %v1776_v0 }
  0x3c   :  { %1348 = vmatmul.mubr.msk.bf16.gmra.mxu0 %vm102_vm0, %v67_v42 }
  0x3d   :  { %243 = vmatprep.mubr.bf16.mxu0 %v1776_v0 }
  0x44   :  { %1349 = vmatmul.mubr.msk.bf16.gmra.mxu0 %vm102_vm0, %v68_v45 }
  0x45   :  { %253 = vmatprep.mubr.bf16.mxu0 %v1776_v0 }
  0x4c   :  { %1350 = vmatmul.mubr.msk.bf16.gmra.mxu0 %vm102_vm0, %v69_v48 }
  0x4d   :  { %263 = vmatprep.mubr.bf16.mxu0 %v1776_v0 }
  0x54   :  { %1351 = vmatmul.mubr.msk.bf16.gmra.mxu0 %vm102_vm0, %v70_v51 }
  0x55   :  { %273 = vmatprep.mubr.bf16.mxu0 %v1776_v0 }
  0x5c   :  { %1352 = vmatmul.mubr.msk.bf16.gmra.mxu0 %vm102_vm0, %v71_v56 }
  0x5d   :  { %283 = vmatprep.mubr.bf16.mxu0 %v1776_v0 }
  0x64   :  { %1353 = vmatmul.mubr.msk.bf16.gmra.mxu0 %vm102_vm0, %v72_v63 }
  0x65   :  { %293 = vmatprep.mubr.bf16.mxu0 %v1776_v0 }
  0x6c   :  { %1354 = vmatmul.mubr.msk.bf16.gmra.mxu0 %vm102_vm0, %v73_v3 }
  0xd4   :  { %v185_v0 = vpop.f32.mrf.mxu0 }
  0xd5   :  { %v186_v15 = vadd.f32 %v185_v0, %v1937_v10 }
  0xd6   :  { %v187_v11 = vpop.f32.mrf.mxu0 }
  0xd7   :  { %v188_v13 = vadd.f32 %v187_v11, %v1935_v9  ;;  %v344_v24 = vmax.f32 %v186_v15, 0.0 }
  0xd8   :  { %v189_v12 = vpop.f32.mrf.mxu0 }
  0xd9   :  { %v190_v14 = vadd.f32 %v189_v12, %v1937_v10  ;;  %v345_v22 = vmax.f32 %v188_v13, 0.0 }
  0xda   :  { %v191_v16 = vpop.f32.mrf.mxu0 }
  0xdb   :  { %v192_v19 = vadd.f32 %v191_v16, %v1935_v9  ;;  %v346_v20 = vmax.f32 %v190_v14, 0.0 }
  0xdc   :  { %v195_v21 = vpop.f32.mrf.mxu0 }
  0xdd   :  { %v347_v23 = vmax.f32 %v192_v19, 0.0  ;;  %v408_v28 = vpack.c.bf16 %v346_v20, %v344_v24  ;;  %v196_v32 = vadd.f32 %v195_v21, %v1937_v10 }
  0xde   :  { %v197_v25 = vpop.f32.mrf.mxu0 }
  0xdf   :  { %v409_v27 = vpack.c.bf16 %v347_v23, %v345_v22  ;;  %v198_v30 = vadd.f32 %v197_v25, %v1935_v9  ;;  %v348_v39 = vmax.f32 %v196_v32, 0.0 }
  0xe0   :  { %v199_v29 = vpop.f32.mrf.mxu0 }
  0xe1   :  { %v200_v31 = vadd.f32 %v199_v29, %v1937_v10  ;;  %601 = vmatprep.mubr.bf16.mxu1 %v409_v27  ;;  %v349_v37 = vmax.f32 %v198_v30, 0.0 }
  0xe2   :  { %v201_v33 = vpop.f32.mrf.mxu0  ;;  %602 = vmatmul.mubr.bf16.vlgmr.msra.gmra.mxu1 %v408_v28 }
  0xe3   :  { %v202_v34 = vadd.f32 %v201_v33, %v1935_v9  ;;  %v350_v35 = vmax.f32 %v200_v31, 0.0 }
  0xe4   :  { %v205_v36 = vpop.f32.mrf.mxu0 }
  0xe5   :  { %v351_v38 = vmax.f32 %v202_v34, 0.0  ;;  %v410_v42 = vpack.c.bf16 %v350_v35, %v348_v39  ;;  %v206_v46 = vadd.f32 %v205_v36, %v1937_v10 }
  0xe6   :  { %v207_v40 = vpop.f32.mrf.mxu0 }
  0xe7   :  { %v411_v41 = vpack.c.bf16 %v351_v38, %v349_v37  ;;  %v208_v44 = vadd.f32 %v207_v40, %v1935_v9  ;;  %v352_v53 = vmax.f32 %v206_v46, 0.0  ;;  %v1963_v38 = vpop.f32.mrf.mxu1 }
  0xe8   :  { %v209_v43 = vpop.f32.mrf.mxu0 }
  0xe9   :  { %v210_v45 = vadd.f32 %v209_v43, %v1937_v10  ;;  %609 = vmatprep.mubr.bf16.mxu1 %v411_v41  ;;  %v353_v51 = vmax.f32 %v208_v44, 0.0  ;;  %v1969_v46 = vpop.f32.mrf.mxu1 }
  0xea   :  { %v211_v47 = vpop.f32.mrf.mxu0  ;;  %610 = vmatmul.mubr.bf16.gmra.mxu1 %v410_v42 }
  0xeb   :  { %v212_v48 = vadd.f32 %v211_v47, %v1935_v9  ;;  %v354_v49 = vmax.f32 %v210_v45, 0.0 }
  0xec   :  { %v215_v50 = vpop.f32.mrf.mxu0 }
  0xed   :  { %v355_v52 = vmax.f32 %v212_v48, 0.0  ;;  %v412_v56 = vpack.c.bf16 %v354_v49, %v352_v53  ;;  %v216_v60 = vadd.f32 %v215_v50, %v1937_v10 }
  0xee   :  { %v217_v54 = vpop.f32.mrf.mxu0 }
  0xef   :  { %v413_v55 = vpack.c.bf16 %v355_v52, %v353_v51  ;;  %v218_v58 = vadd.f32 %v217_v54, %v1935_v9  ;;  %v356_v4 = vmax.f32 %v216_v60, 0.0  ;;  %v1971_v54 = vpop.f32.mrf.mxu1 }
  0xf0   :  { %v219_v57 = vpop.f32.mrf.mxu0 }
  0xf1   :  { %v220_v59 = vadd.f32 %v219_v57, %v1937_v10  ;;  %617 = vmatprep.mubr.bf16.mxu1 %v413_v55  ;;  %v357_v2 = vmax.f32 %v218_v58, 0.0 }
  0xf2   :  { %v221_v61 = vpop.f32.mrf.mxu0  ;;  %618 = vmatmul.mubr.bf16.gmra.mxu1 %v412_v56 }
  0xf3   :  { %v222_v62 = vadd.f32 %v221_v61, %v1935_v9  ;;  %v358_v63 = vmax.f32 %v220_v59, 0.0 }
  0xf4   :  { %v225_v1 = vpop.f32.mrf.mxu0 }
  0xf5   :  { %v359_v3 = vmax.f32 %v222_v62, 0.0  ;;  %v414_v7 = vpack.c.bf16 %v358_v63, %v356_v4  ;;  %v226_v12 = vadd.f32 %v225_v1, %v1937_v10  ;;  %v1977_v62 = vpop.f32.mrf.mxu1 }
  0xf6   :  { %v227_v5 = vpop.f32.mrf.mxu0 }
  0xf7   :  { %v415_v6 = vpack.c.bf16 %v359_v3, %v357_v2  ;;  %v228_v0 = vadd.f32 %v227_v5, %v1935_v9  ;;  %v360_v19 = vmax.f32 %v226_v12, 0.0 }
  0xf8   :  { %v229_v8 = vpop.f32.mrf.mxu0 }
  0xf9   :  { %v230_v11 = vadd.f32 %v229_v8, %v1937_v10  ;;  %625 = vmatprep.mubr.bf16.mxu1 %v415_v6  ;;  %v361_v17 = vmax.f32 %v228_v0, 0.0 }
  0xfa   :  { %v231_v13 = vpop.f32.mrf.mxu0  ;;  %626 = vmatmul.mubr.bf16.gmra.mxu1 %v414_v7  ;;  %v1979_v7 = vpop.f32.mrf.mxu1 }
  0xfb   :  { %v232_v14 = vadd.f32 %v231_v13, %v1935_v9  ;;  %v362_v15 = vmax.f32 %v230_v11, 0.0 }
  0xfc   :  { %v235_v16 = vpop.f32.mrf.mxu0 }
  0xfd   :  { %v363_v18 = vmax.f32 %v232_v14, 0.0  ;;  %v416_v22 = vpack.c.bf16 %v362_v15, %v360_v19  ;;  %v236_v26 = vadd.f32 %v235_v16, %v1937_v10  ;;  %v1985_v16 = vpop.f32.mrf.mxu1 }
  0xfe   :  { %v237_v20 = vpop.f32.mrf.mxu0 }
  0xff   :  { %v417_v21 = vpack.c.bf16 %v363_v18, %v361_v17  ;;  %v238_v24 = vadd.f32 %v237_v20, %v1935_v9  ;;  %v364_v33 = vmax.f32 %v236_v26, 0.0 }
 0x100   :  { %v239_v23 = vpop.f32.mrf.mxu0 }
 0x101   :  { %v240_v25 = vadd.f32 %v239_v23, %v1937_v10  ;;  %633 = vmatprep.mubr.bf16.mxu1 %v417_v21  ;;  %v365_v31 = vmax.f32 %v238_v24, 0.0  ;;  %v1987_v24 = vpop.f32.mrf.mxu1 }
 0x102   :  { %v241_v27 = vpop.f32.mrf.mxu0  ;;  %634 = vmatmul.mubr.bf16.gmra.mxu1 %v416_v22 }
 0x103   :  { %v242_v28 = vadd.f32 %v241_v27, %v1935_v9  ;;  %v366_v29 = vmax.f32 %v240_v25, 0.0 }
 0x104   :  { %v245_v30 = vpop.f32.mrf.mxu0 }
 0x105   :  { %v367_v32 = vmax.f32 %v242_v28, 0.0  ;;  %v418_v36 = vpack.c.bf16 %v366_v29, %v364_v33  ;;  %v246_v41 = vadd.f32 %v245_v30, %v1937_v10  ;;  %v1596_v30 = vld [vmem:[#allocation2 + $0x150] ss:$8 sps:$4 sm:$0xff]   ;;  %v321_v33 = vpop.f32.mrf.mxu1 }
 0x106   :  { %v247_v34 = vpop.f32.mrf.mxu0  ;;  %1525 = vmatprep.subr.bf16.mxu0 %v1596_v30 }
 0x107   :  { %v419_v35 = vpack.c.bf16 %v367_v32, %v365_v31  ;;  %v248_v39 = vadd.f32 %v247_v34, %v1935_v9  ;;  %v368_v49 = vmax.f32 %v246_v41, 0.0  ;;  %1526 = vmatpush3.bf16.msra.mxu0 %v1596_v30 }
 0x108   :  { %v249_v37 = vpop.f32.mrf.mxu0 }
 0x109   :  { %v250_v40 = vadd.f32 %v249_v37, %v1937_v10  ;;  %641 = vmatprep.mubr.bf16.mxu1 %v419_v35  ;;  %v369_v47 = vmax.f32 %v248_v39, 0.0 }
 0x10a   :  { %v251_v42 = vpop.f32.mrf.mxu0  ;;  %642 = vmatmul.mubr.bf16.gmra.mxu1 %v418_v36 }
 0x10b   :  { %v252_v43 = vadd.f32 %v251_v42, %v1935_v9  ;;  %v370_v44 = vmax.f32 %v250_v40, 0.0  ;;  %v1597_v40 = vld [vmem:[#allocation2 + $0x140] ss:$8 sps:$4 sm:$0xff]  }
 0x10c   :  { %v255_v45 = vpop.f32.mrf.mxu0  ;;  %1527 = vmatprep.subr.bf16.mxu0 %v1597_v40 }
 0x10d   :  { %v371_v48 = vmax.f32 %v252_v43, 0.0  ;;  %v420_v52 = vpack.c.bf16 %v370_v44, %v368_v49  ;;  %v256_v57 = vadd.f32 %v255_v45, %v1937_v10  ;;  %v1993_v43 = vpop.f32.mrf.mxu1  ;;  %1528 = vmatpush3.bf16.msra.mxu0 %v1597_v40 }
 0x10e   :  { %v257_v50 = vpop.f32.mrf.mxu0 }
 0x10f   :  { %v421_v51 = vpack.c.bf16 %v371_v48, %v369_v47  ;;  %v258_v55 = vadd.f32 %v257_v50, %v1935_v9  ;;  %v372_v2 = vmax.f32 %v256_v57, 0.0  ;;  %v1598_v50 = vld [vmem:[#allocation2 + $0x130] ss:$8 sps:$4 sm:$0xff]  }
 0x110   :  { %v259_v53 = vpop.f32.mrf.mxu0  ;;  %1529 = vmatprep.subr.bf16.mxu0 %v1598_v50 }
 0x111   :  { %v260_v56 = vadd.f32 %v259_v53, %v1937_v10  ;;  %649 = vmatprep.mubr.bf16.mxu1 %v421_v51  ;;  %v373_v63 = vmax.f32 %v258_v55, 0.0  ;;  %v327_v53 = vpop.f32.mrf.mxu1  ;;  %1530 = vmatpush3.bf16.msra.mxu0 %v1598_v50 }
 0x112   :  { %v261_v58 = vpop.f32.mrf.mxu0  ;;  %650 = vmatmul.mubr.bf16.gmra.mxu1 %v420_v52 }
 0x113   :  { %v262_v59 = vadd.f32 %v261_v58, %v1935_v9  ;;  %v374_v60 = vmax.f32 %v260_v56, 0.0 }
 0x114   :  { %v265_v61 = vpop.f32.mrf.mxu0 }
 0x115   :  { %v375_v1 = vmax.f32 %v262_v59, 0.0  ;;  %v422_v5 = vpack.c.bf16 %v374_v60, %v372_v2  ;;  %v266_v11 = vadd.f32 %v265_v61, %v1937_v10  ;;  %v308_v60 = vadd.f32 %v1969_v46, %v1935_v9 }
 0x116   :  { %v267_v3 = vpop.f32.mrf.mxu0  ;;  %v312_v61 = vadd.f32 %v1977_v62, %v1935_v9  ;;  %v1600_v62 = vld [vmem:[#allocation2 + $0x110] ss:$8 sps:$4 sm:$0xff]  }
 0x117   :  { %v423_v4 = vpack.c.bf16 %v375_v1, %v373_v63  ;;  %v268_v8 = vadd.f32 %v267_v3, %v1935_v9  ;;  %v376_v19 = vmax.f32 %v266_v11, 0.0  ;;  %v1599_v63 = vld [vmem:[#allocation2 + $0x120] ss:$8 sps:$4 sm:$0xff]   ;;  %v329_v3 = vpop.f32.mrf.mxu1 }
 0x118   :  { %v269_v6 = vpop.f32.mrf.mxu0  ;;  %1531 = vmatprep.subr.bf16.mxu0 %v1599_v63  ;;  %v395_v11 = vmax.f32 %v312_v61, 0.0  ;;  %v2030_v61 = vld [vmem:[%s2365_s2 + $0x1] ss:$0 sm:$0xff] }
 0x119   :  { %v270_v0 = vadd.f32 %v269_v6, %v1937_v10  ;;  %657 = vmatprep.mubr.bf16.mxu1 %v423_v4  ;;  %v377_v17 = vmax.f32 %v268_v8, 0.0  ;;  %1532 = vmatpush3.bf16.msra.mxu0 %v1599_v63 }
 0x11a   :  { %v271_v12 = vpop.f32.mrf.mxu0  ;;  %658 = vmatmul.mubr.bf16.gmra.mxu1 %v422_v5  ;;  %1533 = vmatprep.subr.bf16.mxu0 %v1600_v62 }
 0x11b   :  { %v272_v13 = vadd.f32 %v271_v12, %v1935_v9  ;;  %v378_v14 = vmax.f32 %v270_v0, 0.0  ;;  %v393_v0 = vmax.f32 %v308_v60, 0.0 }
 0x11c   :  { %v275_v15 = vpop.f32.mrf.mxu0 }
 0x11d   :  { %v379_v18 = vmax.f32 %v272_v13, 0.0  ;;  %v424_v22 = vpack.c.bf16 %v378_v14, %v376_v19  ;;  %v276_v27 = vadd.f32 %v275_v15, %v1937_v10  ;;  %v331_v13 = vpop.f32.mrf.mxu1  ;;  %1534 = vmatpush3.bf16.msra.mxu0 %v1600_v62  ;;  %v433_v19 = vpack.c.bf16 %v395_v11, %v393_v0 }
 0x11e   :  { %v277_v20 = vpop.f32.mrf.mxu0 }
 0x11f   :  { %v425_v21 = vpack.c.bf16 %v379_v18, %v377_v17  ;;  %v278_v25 = vadd.f32 %v277_v20, %v1935_v9  ;;  %v380_v36 = vmax.f32 %v276_v27, 0.0  ;;  %v318_v20 = vadd.f32 %v1985_v16, %v1935_v9 }
 0x120   :  { %v279_v23 = vpop.f32.mrf.mxu0  ;;  %v328_v16 = vadd.f32 %v327_v53, %v1935_v9 }
 0x121   :  { %v280_v26 = vadd.f32 %v279_v23, %v1937_v10  ;;  %665 = vmatprep.mubr.bf16.mxu1 %v425_v21  ;;  %v381_v34 = vmax.f32 %v278_v25, 0.0  ;;  %v322_v21 = vadd.f32 %v321_v33, %v1935_v9  ;;  %v310_v25 = vadd.f32 %v1971_v54, %v1937_v10 }
 0x122   :  { %v281_v28 = vpop.f32.mrf.mxu0  ;;  %666 = vmatmul.mubr.bf16.gmra.mxu1 %v424_v22  ;;  %v306_v22 = vadd.f32 %v1963_v38, %v1937_v10  ;;  %v397_v27 = vmax.f32 %v318_v20, 0.0  ;;  %v332_v33 = vadd.f32 %v331_v13, %v1935_v9  ;;  %v316_v38 = vadd.f32 %v1979_v7, %v1937_v10 }
 0x123   :  { %v282_v29 = vadd.f32 %v281_v28, %v1935_v9  ;;  %v382_v31 = vmax.f32 %v280_v26, 0.0  ;;  %v335_v26 = vpop.f32.mrf.mxu1  ;;  %v399_v28 = vmax.f32 %v322_v21, 0.0  ;;  %v394_v30 = vmax.f32 %v310_v25, 0.0 }
 0x124   :  { %v285_v32 = vpop.f32.mrf.mxu0  ;;  %v320_v54 = vadd.f32 %v1987_v24, %v1937_v10  ;;  %v326_v7 = vadd.f32 %v1993_v43, %v1937_v10 }
 0x125   :  { %v383_v35 = vmax.f32 %v282_v29, 0.0  ;;  %v426_v41 = vpack.c.bf16 %v382_v31, %v380_v36  ;;  %v286_v47 = vadd.f32 %v285_v32, %v1937_v10  ;;  %v392_v29 = vmax.f32 %v306_v22, 0.0  ;;  %v337_v31 = vpop.f32.mrf.mxu1 }
 0x126   :  { %v287_v37 = vpop.f32.mrf.mxu0  ;;  %v435_v32 = vpack.c.bf16 %v399_v28, %v397_v27  ;;  %v401_v36 = vmax.f32 %v328_v16, 0.0  ;;  %v398_v40 = vmax.f32 %v320_v54, 0.0  ;;  %v400_v50 = vmax.f32 %v326_v7, 0.0 }
 0x127   :  { %v427_v39 = vpack.c.bf16 %v383_v35, %v381_v34  ;;  %v288_v44 = vadd.f32 %v287_v37, %v1935_v9  ;;  %v384_v57 = vmax.f32 %v286_v47, 0.0  ;;  %v432_v34 = vpack.c.bf16 %v394_v30, %v392_v29  ;;  %v339_v35 = vpop.f32.mrf.mxu1 }
 0x128   :  { %v289_v42 = vpop.f32.mrf.mxu0  ;;  %v403_v37 = vmax.f32 %v332_v33, 0.0 }
 0x129   :  { %v290_v45 = vadd.f32 %v289_v42, %v1937_v10  ;;  %673 = vmatprep.mubr.bf16.mxu1 %v427_v39  ;;  %v385_v55 = vmax.f32 %v288_v44, 0.0  ;;  %v396_v39 = vmax.f32 %v316_v38, 0.0  ;;  %v338_v44 = vadd.f32 %v337_v31, %v1935_v9 }
 0x12a   :  { %v291_v48 = vpop.f32.mrf.mxu0  ;;  %674 = vmatmul.mubr.bf16.gmra.mxu1 %v426_v41  ;;  %v341_v41 = vpop.f32.mrf.mxu1  ;;  %v437_v42 = vpack.c.bf16 %v403_v37, %v401_v36 }
 0x12b   :  { %v292_v49 = vadd.f32 %v291_v48, %v1935_v9  ;;  %v386_v51 = vmax.f32 %v290_v45, 0.0  ;;  %v342_v45 = vadd.f32 %v341_v41, %v1935_v9  ;;  %v434_v47 = vpack.c.bf16 %v398_v40, %v396_v39 }
 0x12c   :  { %v295_v52 = vpop.f32.mrf.mxu0  ;;  %v330_v48 = vadd.f32 %v329_v3, %v1937_v10  ;;  %v405_v24 = vmax.f32 %v338_v44, 0.0 }
 0x12d   :  { %v387_v56 = vmax.f32 %v292_v49, 0.0  ;;  %v428_v1 = vpack.c.bf16 %v386_v51, %v384_v57  ;;  %v296_v6 = vadd.f32 %v295_v52, %v1937_v10  ;;  %v407_v49 = vmax.f32 %v342_v45, 0.0 }
 0x12e   :  { %v297_v58 = vpop.f32.mrf.mxu0  ;;  %v402_v51 = vmax.f32 %v330_v48, 0.0 }
 0x12f   :  { %v429_v59 = vpack.c.bf16 %v387_v56, %v385_v55  ;;  %v298_v4 = vadd.f32 %v297_v58, %v1935_v9  ;;  %v388_v17 = vmax.f32 %v296_v6, 0.0  ;;  %v439_v52 = vpack.c.bf16 %v407_v49, %v405_v24 }
 0x130   :  { %v299_v2 = vpop.f32.mrf.mxu0  ;;  %v436_v53 = vpack.c.bf16 %v402_v51, %v400_v50  ;;  %v336_v55 = vadd.f32 %v335_v26, %v1937_v10  ;;  %v340_v56 = vadd.f32 %v339_v35, %v1937_v10 }
 0x131   :  { %v300_v5 = vadd.f32 %v299_v2, %v1937_v10  ;;  %681 = vmatprep.mubr.bf16.mxu1 %v429_v59  ;;  %v389_v14 = vmax.f32 %v298_v4, 0.0 }
 0x132   :  { %v301_v8 = vpop.f32.mrf.mxu0  ;;  %682 = vmatmul.mubr.bf16.gmra.mxu1 %v428_v1  ;;  %v406_v57 = vmax.f32 %v340_v56, 0.0 }
 0x133   :  { %v302_v46 = vadd.f32 %v301_v8, %v1935_v9  ;;  %v390_v12 = vmax.f32 %v300_v5, 0.0  ;;  %v404_v9 = vmax.f32 %v336_v55, 0.0 }
 0x135   :  { %v391_v15 = vmax.f32 %v302_v46, 0.0  ;;  %v430_v23 = vpack.c.bf16 %v390_v12, %v388_v17  ;;  %v438_v58 = vpack.c.bf16 %v406_v57, %v404_v9 }
 0x137   :  { %v431_v18 = vpack.c.bf16 %v391_v15, %v389_v14 }
 0x139   :  { %689 = vmatprep.mubr.bf16.mxu1 %v431_v18 }
 0x13a   :  { %690 = vmatmul.mubr.bf16.gmra.mxu1 %v430_v23 }
 0x13b   :  { %697 = vmatprep.mubr.bf16.mxu1 %v433_v19 }
 0x142   :  { %698 = vmatmul.mubr.bf16.gmra.mxu1 %v432_v34 }
 0x143   :  { %705 = vmatprep.mubr.bf16.mxu1 %v435_v32 }
 0x14a   :  { %706 = vmatmul.mubr.bf16.gmra.mxu1 %v434_v47 }
 0x14b   :  { %713 = vmatprep.mubr.bf16.mxu1 %v437_v42 }
 0x152   :  { %714 = vmatmul.mubr.bf16.gmra.mxu1 %v436_v53 }
 0x153   :  { %721 = vmatprep.mubr.bf16.mxu1 %v439_v52 }
 0x15a   :  { %722 = vmatmul.mubr.bf16.gmra.mxu1 %v438_v58 }
 0x1a2   :  { %v1399_v43 = vpop.f32.mrf.mxu1 }
 0x1a4   :  { %v1400_v59 = vpop.f32.mrf.mxu1 }
 0x1a5   :  { %v1401_v60 = vadd.f32 %v1400_v59, %v1399_v43 }
 0x1a6   :  { %v1402_v63 = vpop.f32.mrf.mxu1 }
 0x1a7   :  { %v604_v2 = vadd.f32 %v1401_v60, %v2030_v61 }
 0x1a8   :  { %v1403_v1 = vpop.f32.mrf.mxu1 }
 0x1a9   :  { %v1404_v3 = vadd.f32 %v1403_v1, %v1402_v63  ;;  %v730_v6 = vmax.f32 %v604_v2, 0.0 }
 0x1aa   :  { %v1405_v10 = vpop.f32.mrf.mxu1 }
 0x1ab   :  { %v607_v4 = vadd.f32 %v1404_v3, %v2030_v61 }
 0x1ac   :  { %v1406_v5 = vpop.f32.mrf.mxu1 }
 0x1ad   :  { %v731_v8 = vmax.f32 %v607_v4, 0.0  ;;  %v1407_v0 = vadd.f32 %v1406_v5, %v1405_v10 }
 0x1ae   :  { %v1408_v46 = vpop.f32.mrf.mxu1 }
 0x1af   :  { %v762_v11 = vpack.c.bf16 %v731_v8, %v730_v6  ;;  %v612_v12 = vadd.f32 %v1407_v0, %v2030_v61 }
 0x1b0   :  { %v1409_v62 = vpop.f32.mrf.mxu1 }
 0x1b1   :  { %v1410_v13 = vadd.f32 %v1409_v62, %v1408_v46  ;;  %1535 = vmatprep.mubr.bf16.mxu0 %v762_v11  ;;  %v732_v18 = vmax.f32 %v612_v12, 0.0 }
 0x1b2   :  { %v1411_v14 = vpop.f32.mrf.mxu1 }
 0x1b3   :  { %v615_v15 = vadd.f32 %v1410_v13, %v2030_v61 }
 0x1b4   :  { %v1412_v17 = vpop.f32.mrf.mxu1 }
 0x1b5   :  { %v733_v19 = vmax.f32 %v615_v15, 0.0  ;;  %v1413_v20 = vadd.f32 %v1412_v17, %v1411_v14 }
 0x1b6   :  { %v1414_v21 = vpop.f32.mrf.mxu1 }
 0x1b7   :  { %v763_v22 = vpack.c.bf16 %v733_v19, %v732_v18  ;;  %v620_v25 = vadd.f32 %v1413_v20, %v2030_v61 }
 0x1b8   :  { %v1415_v23 = vpop.f32.mrf.mxu1 }
 0x1b9   :  { %v1416_v26 = vadd.f32 %v1415_v23, %v1414_v21  ;;  %1536 = vmatmul.mubr.bf16.vlgmr.msra.gmra.mxu0 %v763_v22  ;;  %v734_v30 = vmax.f32 %v620_v25, 0.0 }
 0x1ba   :  { %v1417_v27 = vpop.f32.mrf.mxu1 }
 0x1bb   :  { %v623_v28 = vadd.f32 %v1416_v26, %v2030_v61 }
 0x1bc   :  { %v1418_v29 = vpop.f32.mrf.mxu1 }
 0x1bd   :  { %v735_v31 = vmax.f32 %v623_v28, 0.0  ;;  %v1419_v32 = vadd.f32 %v1418_v29, %v1417_v27 }
 0x1be   :  { %v1420_v16 = vpop.f32.mrf.mxu1 }
 0x1bf   :  { %v764_v33 = vpack.c.bf16 %v735_v31, %v734_v30  ;;  %v628_v38 = vadd.f32 %v1419_v32, %v2030_v61 }
 0x1c0   :  { %v1421_v34 = vpop.f32.mrf.mxu1 }
 0x1c1   :  { %v1422_v54 = vadd.f32 %v1421_v34, %v1420_v16  ;;  %1539 = vmatprep.mubr.bf16.mxu0 %v764_v33  ;;  %v736_v39 = vmax.f32 %v628_v38, 0.0 }
 0x1c2   :  { %v1423_v35 = vpop.f32.mrf.mxu1 }
 0x1c3   :  { %v631_v36 = vadd.f32 %v1422_v54, %v2030_v61 }
 0x1c4   :  { %v1424_v37 = vpop.f32.mrf.mxu1 }
 0x1c5   :  { %v737_v40 = vmax.f32 %v631_v36, 0.0  ;;  %v1425_v41 = vadd.f32 %v1424_v37, %v1423_v35 }
 0x1c6   :  { %v1426_v42 = vpop.f32.mrf.mxu1 }
 0x1c7   :  { %v765_v44 = vpack.c.bf16 %v737_v40, %v736_v39  ;;  %v636_v47 = vadd.f32 %v1425_v41, %v2030_v61 }
 0x1c8   :  { %v1427_v45 = vpop.f32.mrf.mxu1 }
 0x1c9   :  { %v1428_v7 = vadd.f32 %v1427_v45, %v1426_v42  ;;  %1540 = vmatmul.mubr.bf16.gmra.mxu0 %v765_v44  ;;  %v738_v50 = vmax.f32 %v636_v47, 0.0 }
 0x1ca   :  { %v1429_v48 = vpop.f32.mrf.mxu1 }
 0x1cb   :  { %v639_v24 = vadd.f32 %v1428_v7, %v2030_v61 }
 0x1cc   :  { %v1430_v49 = vpop.f32.mrf.mxu1 }
 0x1cd   :  { %v739_v51 = vmax.f32 %v639_v24, 0.0  ;;  %v1431_v52 = vadd.f32 %v1430_v49, %v1429_v48 }
 0x1ce   :  { %v1432_v53 = vpop.f32.mrf.mxu1 }
 0x1cf   :  { %v766_v55 = vpack.c.bf16 %v739_v51, %v738_v50  ;;  %v644_v9 = vadd.f32 %v1431_v52, %v2030_v61 }
 0x1d0   :  { %v1433_v56 = vpop.f32.mrf.mxu1 }
 0x1d1   :  { %v1434_v57 = vadd.f32 %v1433_v56, %v1432_v53  ;;  %1543 = vmatprep.mubr.bf16.mxu0 %v766_v55  ;;  %v740_v60 = vmax.f32 %v644_v9, 0.0 }
 0x1d2   :  { %v1435_v58 = vpop.f32.mrf.mxu1 }
 0x1d3   :  { %v647_v43 = vadd.f32 %v1434_v57, %v2030_v61 }
 0x1d4   :  { %v1436_v59 = vpop.f32.mrf.mxu1 }
 0x1d5   :  { %v741_v63 = vmax.f32 %v647_v43, 0.0  ;;  %v1437_v1 = vadd.f32 %v1436_v59, %v1435_v58 }
 0x1d6   :  { %v1438_v2 = vpop.f32.mrf.mxu1 }
 0x1d7   :  { %v767_v3 = vpack.c.bf16 %v741_v63, %v740_v60  ;;  %v652_v4 = vadd.f32 %v1437_v1, %v2030_v61 }
 0x1d8   :  { %v1439_v10 = vpop.f32.mrf.mxu1 }
 0x1d9   :  { %v1440_v5 = vadd.f32 %v1439_v10, %v1438_v2  ;;  %1544 = vmatmul.mubr.bf16.gmra.mxu0 %v767_v3  ;;  %v742_v46 = vmax.f32 %v652_v4, 0.0 }
 0x1da   :  { %v1441_v6 = vpop.f32.mrf.mxu1 }
 0x1db   :  { %v655_v8 = vadd.f32 %v1440_v5, %v2030_v61 }
 0x1dc   :  { %v1442_v0 = vpop.f32.mrf.mxu1 }
 0x1dd   :  { %v743_v11 = vmax.f32 %v655_v8, 0.0  ;;  %v1443_v62 = vadd.f32 %v1442_v0, %v1441_v6 }
 0x1de   :  { %v1444_v12 = vpop.f32.mrf.mxu1 }
 0x1df   :  { %v768_v13 = vpack.c.bf16 %v743_v11, %v742_v46  ;;  %v660_v15 = vadd.f32 %v1443_v62, %v2030_v61 }
 0x1e0   :  { %v1445_v14 = vpop.f32.mrf.mxu1 }
 0x1e1   :  { %v1446_v17 = vadd.f32 %v1445_v14, %v1444_v12  ;;  %1547 = vmatprep.mubr.bf16.mxu0 %v768_v13  ;;  %v744_v21 = vmax.f32 %v660_v15, 0.0 }
 0x1e2   :  { %v1447_v18 = vpop.f32.mrf.mxu1 }
 0x1e3   :  { %v663_v19 = vadd.f32 %v1446_v17, %v2030_v61 }
 0x1e4   :  { %v1448_v20 = vpop.f32.mrf.mxu1 }
 0x1e5   :  { %v745_v22 = vmax.f32 %v663_v19, 0.0  ;;  %v1449_v23 = vadd.f32 %v1448_v20, %v1447_v18 }
 0x1e6   :  { %v1450_v25 = vpop.f32.mrf.mxu1 }
 0x1e7   :  { %v769_v26 = vpack.c.bf16 %v745_v22, %v744_v21  ;;  %v668_v28 = vadd.f32 %v1449_v23, %v2030_v61 }
 0x1e8   :  { %v1451_v27 = vpop.f32.mrf.mxu1 }
 0x1e9   :  { %v1452_v29 = vadd.f32 %v1451_v27, %v1450_v25  ;;  %1548 = vmatmul.mubr.bf16.gmra.mxu0 %v769_v26  ;;  %v746_v16 = vmax.f32 %v668_v28, 0.0 }
 0x1ea   :  { %v1453_v30 = vpop.f32.mrf.mxu1 }
 0x1eb   :  { %v671_v31 = vadd.f32 %v1452_v29, %v2030_v61 }
 0x1ec   :  { %v1454_v32 = vpop.f32.mrf.mxu1 }
 0x1ed   :  { %v747_v33 = vmax.f32 %v671_v31, 0.0  ;;  %v1455_v34 = vadd.f32 %v1454_v32, %v1453_v30 }
 0x1ee   :  { %v1456_v38 = vpop.f32.mrf.mxu1 }
 0x1ef   :  { %v770_v54 = vpack.c.bf16 %v747_v33, %v746_v16  ;;  %v676_v36 = vadd.f32 %v1455_v34, %v2030_v61 }
 0x1f0   :  { %v1457_v35 = vpop.f32.mrf.mxu1 }
 0x1f1   :  { %v1458_v37 = vadd.f32 %v1457_v35, %v1456_v38  ;;  %1551 = vmatprep.mubr.bf16.mxu0 %v770_v54  ;;  %v748_v42 = vmax.f32 %v676_v36, 0.0 }
 0x1f2   :  { %v1459_v39 = vpop.f32.mrf.mxu1 }
 0x1f3   :  { %v679_v40 = vadd.f32 %v1458_v37, %v2030_v61 }
 0x1f4   :  { %v1460_v41 = vpop.f32.mrf.mxu1 }
 0x1f5   :  { %v749_v44 = vmax.f32 %v679_v40, 0.0  ;;  %v1461_v45 = vadd.f32 %v1460_v41, %v1459_v39 }
 0x1f6   :  { %v1462_v47 = vpop.f32.mrf.mxu1 }
 0x1f7   :  { %v771_v7 = vpack.c.bf16 %v749_v44, %v748_v42  ;;  %v684_v24 = vadd.f32 %v1461_v45, %v2030_v61 }
 0x1f8   :  { %v1463_v48 = vpop.f32.mrf.mxu1 }
 0x1f9   :  { %v1464_v49 = vadd.f32 %v1463_v48, %v1462_v47  ;;  %1552 = vmatmul.mubr.bf16.gmra.mxu0 %v771_v7  ;;  %v750_v53 = vmax.f32 %v684_v24, 0.0  ;;  %v2067_v7 = vld [vmem:[%s2365_s2 + $0x2] ss:$0 sm:$0xff]  ;;  %s1777_s2 = smov [#allocation5]  }
 0x1fa   :  { %v1465_v50 = vpop.f32.mrf.mxu1  ;;  %s1329_s8 = sshll.u32 %s1777_s2, 4  ;;  %s1330_s8 = int_to_ptr.vmem [resolvable:$true] %s1329_s8 }
 0x1fb   :  { %v687_v51 = vadd.f32 %v1464_v49, %v2030_v61  ;;  %s1749_s9 = scalar_lea.vmem %s1330_s8, 4096  ;;  %p1754_p6 = scmp.lt.s32.totalorder %s1330_s8, %s1330_s8 }
 0x1fc   :  { %v1466_v52 = vpop.f32.mrf.mxu1  ;;  %p1750_p5 = scmp.ne.s32.totalorder %s1330_s8, %s1749_s9  ;;  %p1755_p7 = scmp.lt.s32.totalorder %s1749_s9, %s1749_s9 }
 0x1fd   :  { %v751_v55 = vmax.f32 %v687_v51, 0.0  ;;  %v1467_v56 = vadd.f32 %v1466_v52, %v1465_v50 }
 0x1fe   :  { %v1468_v9 = vpop.f32.mrf.mxu1  ;;  %p1756_p8 = por %p1755_p7, %p1754_p6 }
 0x1ff   :  { %v772_v57 = vpack.c.bf16 %v751_v55, %v750_v53  ;;  %v692_v43 = vadd.f32 %v1467_v56, %v2030_v61 }
 0x200   :  { %v1469_v58 = vpop.f32.mrf.mxu1  ;;  %p1757_p9 = pnand %p1756_p8, %p1750_p5 }
 0x201   :  { %v1470_v59 = vadd.f32 %v1469_v58, %v1468_v9  ;;  %1555 = vmatprep.mubr.bf16.mxu0 %v772_v57  ;;  %v752_v2 = vmax.f32 %v692_v43, 0.0 }
 0x202   :  { %v1471_v60 = vpop.f32.mrf.mxu1 }
 0x203   :  { %v695_v63 = vadd.f32 %v1470_v59, %v2030_v61 }
 0x204   :  { %v1472_v1 = vpop.f32.mrf.mxu1 }
 0x205   :  { %v753_v3 = vmax.f32 %v695_v63, 0.0  ;;  %v1473_v10 = vadd.f32 %v1472_v1, %v1471_v60 }
 0x206   :  { %v1474_v4 = vpop.f32.mrf.mxu1 }
 0x207   :  { %v773_v5 = vpack.c.bf16 %v753_v3, %v752_v2  ;;  %v700_v8 = vadd.f32 %v1473_v10, %v2030_v61 }
 0x208   :  { %v1475_v6 = vpop.f32.mrf.mxu1 }
 0x209   :  { %v1476_v0 = vadd.f32 %v1475_v6, %v1474_v4  ;;  %1556 = vmatmul.mubr.bf16.gmra.mxu0 %v773_v5  ;;  %v754_v12 = vmax.f32 %v700_v8, 0.0 }
 0x20a   :  { %v1477_v46 = vpop.f32.mrf.mxu1 }
 0x20b   :  { %v703_v11 = vadd.f32 %v1476_v0, %v2030_v61 }
 0x20c   :  { %v1478_v62 = vpop.f32.mrf.mxu1 }
 0x20d   :  { %v755_v13 = vmax.f32 %v703_v11, 0.0  ;;  %v1479_v14 = vadd.f32 %v1478_v62, %v1477_v46 }
 0x20e   :  { %v1480_v15 = vpop.f32.mrf.mxu1 }
 0x20f   :  { %v774_v17 = vpack.c.bf16 %v755_v13, %v754_v12  ;;  %v708_v19 = vadd.f32 %v1479_v14, %v2030_v61 }
 0x210   :  { %v1481_v18 = vpop.f32.mrf.mxu1 }
 0x211   :  { %v1482_v20 = vadd.f32 %v1481_v18, %v1480_v15  ;;  %1559 = vmatprep.mubr.bf16.mxu0 %v774_v17  ;;  %v756_v25 = vmax.f32 %v708_v19, 0.0 }
 0x212   :  { %v1483_v21 = vpop.f32.mrf.mxu1 }
 0x213   :  { %v711_v22 = vadd.f32 %v1482_v20, %v2030_v61 }
 0x214   :  { %v1484_v23 = vpop.f32.mrf.mxu1 }
 0x215   :  { %v757_v26 = vmax.f32 %v711_v22, 0.0  ;;  %v1485_v27 = vadd.f32 %v1484_v23, %v1483_v21 }
 0x216   :  { %v1486_v28 = vpop.f32.mrf.mxu1 }
 0x217   :  { %v775_v29 = vpack.c.bf16 %v757_v26, %v756_v25  ;;  %v716_v31 = vadd.f32 %v1485_v27, %v2030_v61 }
 0x218   :  { %v1487_v30 = vpop.f32.mrf.mxu1 }
 0x219   :  { %v1488_v32 = vadd.f32 %v1487_v30, %v1486_v28  ;;  %1560 = vmatmul.mubr.bf16.gmra.mxu0 %v775_v29  ;;  %v758_v38 = vmax.f32 %v716_v31, 0.0 }
 0x21a   :  { %v1489_v16 = vpop.f32.mrf.mxu1 }
 0x21b   :  { %v719_v33 = vadd.f32 %v1488_v32, %v2030_v61 }
 0x21c   :  { %v1490_v34 = vpop.f32.mrf.mxu1 }
 0x21d   :  { %v759_v54 = vmax.f32 %v719_v33, 0.0  ;;  %v1491_v35 = vadd.f32 %v1490_v34, %v1489_v16 }
 0x21e   :  { %v1492_v36 = vpop.f32.mrf.mxu1 }
 0x21f   :  { %v776_v37 = vpack.c.bf16 %v759_v54, %v758_v38  ;;  %v724_v40 = vadd.f32 %v1491_v35, %v2030_v61 }
 0x220   :  { %v1493_v39 = vpop.f32.mrf.mxu1 }
 0x221   :  { %v1494_v41 = vadd.f32 %v1493_v39, %v1492_v36  ;;  %1563 = vmatprep.mubr.bf16.mxu0 %v776_v37  ;;  %v760_v44 = vmax.f32 %v724_v40, 0.0 }
 0x223   :  { %v727_v42 = vadd.f32 %v1494_v41, %v2030_v61 }
 0x225   :  { %v761_v45 = vmax.f32 %v727_v42, 0.0 }
 0x227   :  { %v777_v47 = vpack.c.bf16 %v761_v45, %v760_v44 }
 0x229   :  { %1564 = vmatmul.mubr.bf16.gmra.mxu0 %v777_v47 }
 0x279   :  { %v1537_v48 = vpop.f32.mrf.mxu0 }
 0x27a   :  { %v2070_v24 = vadd.f32 %v1537_v48, %v2067_v7 }
 0x27b   :  { %v877_v49 = vpop.f32.mrf.mxu0 }
 0x27c   :  { %v2073_v50 = vadd.f32 %v877_v49, %v2067_v7  ;;  %1008 = vmax.xlane.f32.xlu1 %v2070_v24 }
 0x27d   :  { %v1538_v61 = vpop.f32.mrf.mxu0 }
 0x27e   :  { %v2077_v51 = vadd.f32 %v1538_v61, %v2067_v7  ;;  %1004 = vmax.xlane.f32.xlu0 %v2073_v50 }
 0x27f   :  { %v880_v52 = vpop.f32.mrf.mxu0 }
 0x280   :  { %v2081_v53 = vadd.f32 %v880_v52, %v2067_v7  ;;  %1010 = vmax.xlane.f32.xlu1 %v2077_v51 }
 0x282   :  { %1006 = vmax.xlane.f32.xlu0 %v2081_v53 }
 0x289   :  { %v1541_v55 = vpop.f32.mrf.mxu0 }
 0x28a   :  { %v2086_v56 = vadd.f32 %v1541_v55, %v2067_v7 }
 0x28b   :  { %v893_v9 = vpop.f32.mrf.mxu0 }
 0x28c   :  { %1016 = vmax.xlane.f32.xlu0 %v2086_v56  ;;  %v2090_v58 = vadd.f32 %v893_v9, %v2067_v7 }
 0x28d   :  { %v1542_v57 = vpop.f32.mrf.mxu0 }
 0x28e   :  { %v2093_v43 = vadd.f32 %v1542_v57, %v2067_v7 }
 0x28f   :  { %v896_v59 = vpop.f32.mrf.mxu0 }
 0x290   :  { %1018 = vmax.xlane.f32.xlu1 %v2093_v43  ;;  %1012 = vmax.xlane.f32.xlu0 %v2090_v58  ;;  %v2098_v60 = vadd.f32 %v896_v59, %v2067_v7 }
 0x294   :  { %1014 = vmax.xlane.f32.xlu1 %v2098_v60 }
 0x299   :  { %v1545_v63 = vpop.f32.mrf.mxu0 }
 0x29a   :  { %v2102_v1 = vadd.f32 %v1545_v63, %v2067_v7 }
 0x29b   :  { %v909_v2 = vpop.f32.mrf.mxu0 }
 0x29c   :  { %1024 = vmax.xlane.f32.xlu0 %v2102_v1  ;;  %v2106_v10 = vadd.f32 %v909_v2, %v2067_v7 }
 0x29d   :  { %v1546_v3 = vpop.f32.mrf.mxu0 }
 0x29e   :  { %v2109_v4 = vadd.f32 %v1546_v3, %v2067_v7 }
 0x29f   :  { %v912_v5 = vpop.f32.mrf.mxu0 }
 0x2a0   :  { %1026 = vmax.xlane.f32.xlu1 %v2109_v4  ;;  %1020 = vmax.xlane.f32.xlu0 %v2106_v10  ;;  %v2114_v6 = vadd.f32 %v912_v5, %v2067_v7 }
 0x2a4   :  { %1022 = vmax.xlane.f32.xlu1 %v2114_v6 }
 0x2a9   :  { %v1549_v8 = vpop.f32.mrf.mxu0 }
 0x2aa   :  { %v2118_v0 = vadd.f32 %v1549_v8, %v2067_v7 }
 0x2ab   :  { %v925_v46 = vpop.f32.mrf.mxu0 }
 0x2ac   :  { %1032 = vmax.xlane.f32.xlu0 %v2118_v0  ;;  %v2122_v62 = vadd.f32 %v925_v46, %v2067_v7 }
 0x2ad   :  { %v1550_v11 = vpop.f32.mrf.mxu0 }
 0x2ae   :  { %v2125_v12 = vadd.f32 %v1550_v11, %v2067_v7 }
 0x2af   :  { %v928_v13 = vpop.f32.mrf.mxu0 }
 0x2b0   :  { %1034 = vmax.xlane.f32.xlu1 %v2125_v12  ;;  %1028 = vmax.xlane.f32.xlu0 %v2122_v62  ;;  %v2130_v14 = vadd.f32 %v928_v13, %v2067_v7 }
 0x2b4   :  { %1030 = vmax.xlane.f32.xlu1 %v2130_v14 }
 0x2b9   :  { %v1553_v15 = vpop.f32.mrf.mxu0 }
 0x2ba   :  { %v2134_v17 = vadd.f32 %v1553_v15, %v2067_v7 }
 0x2bb   :  { %v941_v18 = vpop.f32.mrf.mxu0 }
 0x2bc   :  { %1040 = vmax.xlane.f32.xlu0 %v2134_v17  ;;  %v2138_v20 = vadd.f32 %v941_v18, %v2067_v7 }
 0x2bd   :  { %v1554_v19 = vpop.f32.mrf.mxu0 }
 0x2be   :  { %v2141_v21 = vadd.f32 %v1554_v19, %v2067_v7 }
 0x2bf   :  { %v944_v22 = vpop.f32.mrf.mxu0 }
 0x2c0   :  { %1042 = vmax.xlane.f32.xlu1 %v2141_v21  ;;  %1036 = vmax.xlane.f32.xlu0 %v2138_v20  ;;  %v2146_v23 = vadd.f32 %v944_v22, %v2067_v7 }
 0x2c4   :  { %1038 = vmax.xlane.f32.xlu1 %v2146_v23 }
 0x2c9   :  { %v1557_v25 = vpop.f32.mrf.mxu0 }
 0x2ca   :  { %v2150_v26 = vadd.f32 %v1557_v25, %v2067_v7 }
 0x2cb   :  { %v957_v27 = vpop.f32.mrf.mxu0 }
 0x2cc   :  { %1048 = vmax.xlane.f32.xlu0 %v2150_v26  ;;  %v2154_v29 = vadd.f32 %v957_v27, %v2067_v7 }
 0x2cd   :  { %v1558_v28 = vpop.f32.mrf.mxu0 }
 0x2ce   :  { %v2157_v30 = vadd.f32 %v1558_v28, %v2067_v7 }
 0x2cf   :  { %v960_v31 = vpop.f32.mrf.mxu0 }
 0x2d0   :  { %1050 = vmax.xlane.f32.xlu1 %v2157_v30  ;;  %1044 = vmax.xlane.f32.xlu0 %v2154_v29  ;;  %v2162_v32 = vadd.f32 %v960_v31, %v2067_v7 }
 0x2d4   :  { %1046 = vmax.xlane.f32.xlu1 %v2162_v32 }
 0x2d9   :  { %v1561_v16 = vpop.f32.mrf.mxu0 }
 0x2da   :  { %v2166_v33 = vadd.f32 %v1561_v16, %v2067_v7 }
 0x2db   :  { %v973_v34 = vpop.f32.mrf.mxu0 }
 0x2dc   :  { %1056 = vmax.xlane.f32.xlu0 %v2166_v33  ;;  %v2170_v54 = vadd.f32 %v973_v34, %v2067_v7 }
 0x2dd   :  { %v1562_v38 = vpop.f32.mrf.mxu0 }
 0x2de   :  { %v2173_v35 = vadd.f32 %v1562_v38, %v2067_v7 }
 0x2df   :  { %v976_v36 = vpop.f32.mrf.mxu0 }
 0x2e0   :  { %1058 = vmax.xlane.f32.xlu1 %v2173_v35  ;;  %1052 = vmax.xlane.f32.xlu0 %v2170_v54  ;;  %v2178_v37 = vadd.f32 %v976_v36, %v2067_v7 }
 0x2e4   :  { %1054 = vmax.xlane.f32.xlu1 %v2178_v37 }
 0x2e9   :  { %v1565_v39 = vpop.f32.mrf.mxu0 }
 0x2ea   :  { %v2186_v45 = vadd.f32 %v1565_v39, %v2067_v7 }
 0x2eb   :  { %v989_v40 = vpop.f32.mrf.mxu0 }
 0x2ec   :  { %v2182_v41 = vadd.f32 %v989_v40, %v2067_v7 }
 0x2ed   :  { %v1566_v42 = vpop.f32.mrf.mxu0 }
 0x2ee   :  { %1060 = vmax.xlane.f32.xlu0 %v2182_v41  ;;  %v2194_v48 = vadd.f32 %v1566_v42, %v2067_v7 }
 0x2ef   :  { %v992_v44 = vpop.f32.mrf.mxu0 }
 0x2f0   :  { %v2189_v47 = vadd.f32 %v992_v44, %v2067_v7 }
 0x2f2   :  { %1062 = vmax.xlane.f32.xlu1 %v2189_v47  ;;  %1064 = vmax.xlane.f32.xlu0 %v2186_v45 }
 0x2f6   :  { %1066 = vmax.xlane.f32.xlu1 %v2194_v48 }
 0x305   :  { %v1009_v49 = vpop.xlane.xlu1 %1008 }
 0x306   :  { %v1070_v61 = vsub.f32 %v2070_v24, %v1009_v49 }
 0x307   :  { %v1005_v52 = vpop.xlane.xlu0 %1004 }
 0x308   :  { %v1104_v55 = vmul.f32 1.442695, %v1070_v61  ;;  %v1068_v9 = vsub.f32 %v2073_v50, %v1005_v52 }
 0x309   :  { %v1011_v57 = vpop.xlane.xlu1 %1010 }
 0x30a   :  { %1601 = vpow2.f32 %v1104_v55  ;;  %v1100_v59 = vmul.f32 1.442695, %v1068_v9  ;;  %v1071_v63 = vsub.f32 %v2077_v51, %v1011_v57 }
 0x30b   :  { %v1007_v2 = vpop.xlane.xlu0 %1006 }
 0x30c   :  { %v1106_v3 = vmul.f32 1.442695, %v1071_v63  ;;  %v1069_v5 = vsub.f32 %v2081_v53, %v1007_v2  ;;  %1603 = vpow2.f32 %v1100_v59 }
 0x30e   :  { %1605 = vpow2.f32 %v1106_v3  ;;  %v1102_v7 = vmul.f32 1.442695, %v1069_v5 }
 0x310   :  { %1607 = vpow2.f32 %v1102_v7 }
 0x315   :  { %v1017_v8 = vpop.xlane.xlu0 %1016 }
 0x316   :  { %v1074_v24 = vsub.f32 %v2086_v56, %v1017_v8 }
 0x317   :  { %v2202_v46 = vpop.eup %1601 }
 0x318   :  { %v1112_v11 = vmul.f32 1.442695, %v1074_v24  ;;  %1168 = vadd.xlane.f32.xlu0 %v2202_v46 }
 0x319   :  { %v1019_v50 = vpop.xlane.xlu1 %1018  ;;  %v1013_v13 = vpop.xlane.xlu0 %1012 }
 0x31a   :  { %v2205_v15 = vpop.eup %1603  ;;  %1609 = vpow2.f32 %v1112_v11  ;;  %v1075_v51 = vsub.f32 %v2093_v43, %v1019_v50  ;;  %v1072_v53 = vsub.f32 %v2090_v58, %v1013_v13 }
 0x31b   :  { %v2209_v18 = vpop.eup %1605 }
 0x31c   :  { %v1114_v19 = vmul.f32 1.442695, %v1075_v51  ;;  %v1108_v22 = vmul.f32 1.442695, %v1072_v53  ;;  %1170 = vadd.xlane.f32.xlu1 %v2209_v18  ;;  %1164 = vadd.xlane.f32.xlu0 %v2205_v15 }
 0x31d   :  { %v1015_v56 = vpop.xlane.xlu1 %1014  ;;  %v2214_v27 = vpop.eup %1607 }
 0x31e   :  { %1611 = vpow2.f32 %v1114_v19  ;;  %v1073_v25 = vsub.f32 %v2098_v60, %v1015_v56 }
 0x31f   :  { %1613 = vpow2.f32 %v1108_v22 }
 0x320   :  { %v1110_v28 = vmul.f32 1.442695, %v1073_v25  ;;  %1166 = vadd.xlane.f32.xlu1 %v2214_v27 }
 0x322   :  { %1615 = vpow2.f32 %v1110_v28 }
 0x325   :  { %v1025_v58 = vpop.xlane.xlu0 %1024 }
 0x326   :  { %v1078_v43 = vsub.f32 %v2102_v1, %v1025_v58 }
 0x327   :  { %v2218_v31 = vpop.eup %1609 }
 0x328   :  { %v1120_v16 = vmul.f32 1.442695, %v1078_v43  ;;  %1176 = vadd.xlane.f32.xlu0 %v2218_v31 }
 0x329   :  { %v1027_v34 = vpop.xlane.xlu1 %1026  ;;  %v1021_v38 = vpop.xlane.xlu0 %1020 }
 0x32a   :  { %1617 = vpow2.f32 %v1120_v16  ;;  %v1079_v60 = vsub.f32 %v2109_v4, %v1027_v34  ;;  %v1076_v36 = vsub.f32 %v2106_v10, %v1021_v38 }
 0x32b   :  { %v2223_v39 = vpop.eup %1611 }
 0x32c   :  { %v2225_v40 = vpop.eup %1613  ;;  %v1122_v42 = vmul.f32 1.442695, %v1079_v60  ;;  %v1116_v44 = vmul.f32 1.442695, %v1076_v36  ;;  %1178 = vadd.xlane.f32.xlu1 %v2223_v39 }
 0x32d   :  { %1172 = vadd.xlane.f32.xlu0 %v2225_v40  ;;  %v1023_v1 = vpop.xlane.xlu1 %1022 }
 0x32e   :  { %1619 = vpow2.f32 %v1122_v42  ;;  %v1077_v49 = vsub.f32 %v2114_v6, %v1023_v1 }
 0x32f   :  { %v2230_v61 = vpop.eup %1615  ;;  %1621 = vpow2.f32 %v1116_v44 }
 0x330   :  { %v1118_v4 = vmul.f32 1.442695, %v1077_v49  ;;  %1174 = vadd.xlane.f32.xlu1 %v2230_v61 }
 0x332   :  { %1623 = vpow2.f32 %v1118_v4 }
 0x335   :  { %v1033_v10 = vpop.xlane.xlu0 %1032 }
 0x336   :  { %v1082_v52 = vsub.f32 %v2118_v0, %v1033_v10 }
 0x337   :  { %v2234_v55 = vpop.eup %1617 }
 0x338   :  { %v1128_v9 = vmul.f32 1.442695, %v1082_v52  ;;  %1184 = vadd.xlane.f32.xlu0 %v2234_v55 }
 0x339   :  { %v1035_v57 = vpop.xlane.xlu1 %1034  ;;  %v1029_v59 = vpop.xlane.xlu0 %1028 }
 0x33a   :  { %1625 = vpow2.f32 %v1128_v9  ;;  %v1083_v6 = vsub.f32 %v2125_v12, %v1035_v57  ;;  %v1080_v63 = vsub.f32 %v2122_v62, %v1029_v59 }
 0x33b   :  { %v2239_v2 = vpop.eup %1619 }
 0x33c   :  { %v2241_v3 = vpop.eup %1621  ;;  %v1130_v5 = vmul.f32 1.442695, %v1083_v6  ;;  %v1124_v7 = vmul.f32 1.442695, %v1080_v63  ;;  %1186 = vadd.xlane.f32.xlu1 %v2239_v2 }
 0x33d   :  { %1180 = vadd.xlane.f32.xlu0 %v2241_v3  ;;  %v1031_v0 = vpop.xlane.xlu1 %1030 }
 0x33e   :  { %1627 = vpow2.f32 %v1130_v5  ;;  %v1081_v8 = vsub.f32 %v2130_v14, %v1031_v0 }
 0x33f   :  { %v2246_v24 = vpop.eup %1623  ;;  %1629 = vpow2.f32 %v1124_v7 }
 0x340   :  { %v1126_v12 = vmul.f32 1.442695, %v1081_v8  ;;  %1182 = vadd.xlane.f32.xlu1 %v2246_v24 }
 0x342   :  { %1631 = vpow2.f32 %v1126_v12 }
 0x345   :  { %v1041_v62 = vpop.xlane.xlu0 %1040 }
 0x346   :  { %v1086_v11 = vsub.f32 %v2134_v17, %v1041_v62 }
 0x347   :  { %v2250_v50 = vpop.eup %1625 }
 0x348   :  { %v1136_v13 = vmul.f32 1.442695, %v1086_v11  ;;  %1192 = vadd.xlane.f32.xlu0 %v2250_v50 }
 0x349   :  { %v1043_v51 = vpop.xlane.xlu1 %1042  ;;  %v1037_v53 = vpop.xlane.xlu0 %1036 }
 0x34a   :  { %1633 = vpow2.f32 %v1136_v13  ;;  %v1087_v14 = vsub.f32 %v2141_v21, %v1043_v51  ;;  %v1084_v19 = vsub.f32 %v2138_v20, %v1037_v53 }
 0x34b   :  { %v2255_v22 = vpop.eup %1627 }
 0x34c   :  { %v2257_v56 = vpop.eup %1629  ;;  %v1138_v25 = vmul.f32 1.442695, %v1087_v14  ;;  %v1132_v28 = vmul.f32 1.442695, %v1084_v19  ;;  %1194 = vadd.xlane.f32.xlu1 %v2255_v22 }
 0x34d   :  { %1188 = vadd.xlane.f32.xlu0 %v2257_v56  ;;  %v1039_v17 = vpop.xlane.xlu1 %1038 }
 0x34e   :  { %1635 = vpow2.f32 %v1138_v25  ;;  %v1085_v58 = vsub.f32 %v2146_v23, %v1039_v17 }
 0x34f   :  { %v2262_v43 = vpop.eup %1631  ;;  %1637 = vpow2.f32 %v1132_v28 }
 0x350   :  { %v1134_v21 = vmul.f32 1.442695, %v1085_v58  ;;  %1190 = vadd.xlane.f32.xlu1 %v2262_v43 }
 0x352   :  { %1639 = vpow2.f32 %v1134_v21 }
 0x355   :  { %v1049_v20 = vpop.xlane.xlu0 %1048 }
 0x356   :  { %v1090_v16 = vsub.f32 %v2150_v26, %v1049_v20 }
 0x357   :  { %v2266_v34 = vpop.eup %1633 }
 0x358   :  { %v1144_v38 = vmul.f32 1.442695, %v1090_v16  ;;  %1200 = vadd.xlane.f32.xlu0 %v2266_v34 }
 0x359   :  { %v1051_v60 = vpop.xlane.xlu1 %1050  ;;  %v1045_v36 = vpop.xlane.xlu0 %1044 }
 0x35a   :  { %1641 = vpow2.f32 %v1144_v38  ;;  %v1091_v23 = vsub.f32 %v2157_v30, %v1051_v60  ;;  %v1088_v42 = vsub.f32 %v2154_v29, %v1045_v36 }
 0x35b   :  { %v2271_v44 = vpop.eup %1635 }
 0x35c   :  { %v2273_v1 = vpop.eup %1637  ;;  %v1146_v49 = vmul.f32 1.442695, %v1091_v23  ;;  %v1140_v4 = vmul.f32 1.442695, %v1088_v42  ;;  %1202 = vadd.xlane.f32.xlu1 %v2271_v44 }
 0x35d   :  { %1196 = vadd.xlane.f32.xlu0 %v2273_v1  ;;  %v1047_v26 = vpop.xlane.xlu1 %1046 }
 0x35e   :  { %1643 = vpow2.f32 %v1146_v49  ;;  %v1089_v10 = vsub.f32 %v2162_v32, %v1047_v26 }
 0x35f   :  { %v2278_v52 = vpop.eup %1639  ;;  %1645 = vpow2.f32 %v1140_v4 }
 0x360   :  { %v1142_v30 = vmul.f32 1.442695, %v1089_v10  ;;  %1198 = vadd.xlane.f32.xlu1 %v2278_v52 }
 0x362   :  { %1647 = vpow2.f32 %v1142_v30 }
 0x365   :  { %v1057_v29 = vpop.xlane.xlu0 %1056 }
 0x366   :  { %v1094_v9 = vsub.f32 %v2166_v33, %v1057_v29 }
 0x367   :  { %v2282_v57 = vpop.eup %1641 }
 0x368   :  { %v1152_v59 = vmul.f32 1.442695, %v1094_v9  ;;  %1208 = vadd.xlane.f32.xlu0 %v2282_v57 }
 0x369   :  { %v1059_v6 = vpop.xlane.xlu1 %1058  ;;  %v1053_v63 = vpop.xlane.xlu0 %1052 }
 0x36a   :  { %1649 = vpow2.f32 %v1152_v59  ;;  %v1095_v32 = vsub.f32 %v2173_v35, %v1059_v6  ;;  %v1092_v5 = vsub.f32 %v2170_v54, %v1053_v63 }
 0x36b   :  { %v2287_v7 = vpop.eup %1643 }
 0x36c   :  { %v2289_v0 = vpop.eup %1645  ;;  %v1154_v8 = vmul.f32 1.442695, %v1095_v32  ;;  %v1148_v12 = vmul.f32 1.442695, %v1092_v5  ;;  %1210 = vadd.xlane.f32.xlu1 %v2287_v7 }
 0x36d   :  { %1204 = vadd.xlane.f32.xlu0 %v2289_v0  ;;  %v1055_v33 = vpop.xlane.xlu1 %1054 }
 0x36e   :  { %1651 = vpow2.f32 %v1154_v8  ;;  %v1093_v62 = vsub.f32 %v2178_v37, %v1055_v33 }
 0x36f   :  { %v2294_v11 = vpop.eup %1647  ;;  %1653 = vpow2.f32 %v1148_v12 }
 0x370   :  { %v1150_v35 = vmul.f32 1.442695, %v1093_v62  ;;  %1206 = vadd.xlane.f32.xlu1 %v2294_v11 }
 0x372   :  { %1655 = vpow2.f32 %v1150_v35 }
 0x377   :  { %v2297_v54 = vpop.eup %1649  ;;  %v1061_v13 = vpop.xlane.xlu0 %1060 }
 0x378   :  { %v1096_v51 = vsub.f32 %v2182_v41, %v1061_v13  ;;  %1216 = vadd.xlane.f32.xlu0 %v2297_v54 }
 0x37a   :  { %v1156_v53 = vmul.f32 1.442695, %v1096_v51 }
 0x37b   :  { %v2301_v14 = vpop.eup %1651  ;;  %v1063_v19 = vpop.xlane.xlu1 %1062 }
 0x37c   :  { %v1065_v25 = vpop.xlane.xlu0 %1064  ;;  %v2303_v37 = vpop.eup %1653  ;;  %1657 = vpow2.f32 %v1156_v53  ;;  %v1097_v28 = vsub.f32 %v2189_v47, %v1063_v19  ;;  %1218 = vadd.xlane.f32.xlu1 %v2301_v14 }
 0x37d   :  { %v1098_v17 = vsub.f32 %v2186_v45, %v1065_v25  ;;  %1212 = vadd.xlane.f32.xlu0 %v2303_v37 }
 0x37e   :  { %v1158_v58 = vmul.f32 1.442695, %v1097_v28 }
 0x37f   :  { %v1160_v41 = vmul.f32 1.442695, %v1098_v17  ;;  %v2309_v21 = vpop.eup %1655  ;;  %v1067_v20 = vpop.xlane.xlu1 %1066 }
 0x380   :  { %1659 = vpow2.f32 %v1158_v58  ;;  %v1099_v16 = vsub.f32 %v2194_v48, %v1067_v20  ;;  %1214 = vadd.xlane.f32.xlu1 %v2309_v21 }
 0x381   :  { %1661 = vpow2.f32 %v1160_v41 }
 0x382   :  { %v1162_v38 = vmul.f32 1.442695, %v1099_v16 }
 0x384   :  { %1663 = vpow2.f32 %v1162_v38 }
 0x389   :  { %v2313_v47 = vpop.eup %1657 }
 0x38a   :  { %1220 = vadd.xlane.f32.xlu0 %v2313_v47 }
 0x38d   :  { %v2316_v45 = vpop.eup %1659 }
 0x38e   :  { %v2318_v60 = vpop.eup %1661  ;;  %1222 = vadd.xlane.f32.xlu1 %v2316_v45 }
 0x38f   :  { %1224 = vadd.xlane.f32.xlu0 %v2318_v60 }
 0x391   :  { %v2322_v36 = vpop.eup %1663 }
 0x392   :  { %1226 = vadd.xlane.f32.xlu1 %v2322_v36 }
 0x3a1   :  { %v1169_v48 = vpop.xlane.xlu0 %1168 }
 0x3a2   :  { %1665 = vrcp.f32 %v1169_v48 }
 0x3a5   :  { %v1171_v23 = vpop.xlane.xlu1 %1170  ;;  %v1165_v42 = vpop.xlane.xlu0 %1164 }
 0x3a6   :  { %1667 = vrcp.f32 %v1171_v23 }
 0x3a7   :  { %1669 = vrcp.f32 %v1165_v42 }
 0x3a9   :  { %v1167_v49 = vpop.xlane.xlu1 %1166 }
 0x3aa   :  { %1671 = vrcp.f32 %v1167_v49 }
 0x3af   :  { %v1666_v4 = vpop.eup %1665 }
 0x3b0   :  { %v1233_v26 = vmul.f32 %v1666_v4, %v2202_v46 }
 0x3b1   :  { %v1177_v10 = vpop.xlane.xlu0 %1176 }
 0x3b2   :  { %1294 = vst [vmem:[#allocation5 + $0x10] sm:$0xff] %v1233_v26  ;;  %1673 = vrcp.f32 %v1177_v10 }
 0x3b3   :  { %v1668_v30 = vpop.eup %1667 }
 0x3b4   :  { %v1670_v29 = vpop.eup %1669  ;;  %v1235_v9 = vmul.f32 %v1668_v30, %v2209_v18 }
 0x3b5   :  { %v1229_v59 = vmul.f32 %v1670_v29, %v2205_v15  ;;  %v1179_v6 = vpop.xlane.xlu1 %1178 }
 0x3b6   :  { %1295 = vst [vmem:[#allocation5 + $0x18] sm:$0xff] %v1235_v9  ;;  %1675 = vrcp.f32 %v1179_v6  ;;  %v1173_v63 = vpop.xlane.xlu0 %1172 }
 0x3b7   :  { %v1672_v32 = vpop.eup %1671  ;;  %1292 = vst [vmem:[#allocation5] sm:$0xff] %v1229_v59  ;;  %1677 = vrcp.f32 %v1173_v63 }
 0x3b8   :  { %v1231_v5 = vmul.f32 %v1672_v32, %v2214_v27 }
 0x3b9   :  { %v1175_v8 = vpop.xlane.xlu1 %1174 }
 0x3ba   :  { %1293 = vst [vmem:[#allocation5 + $0x8] sm:$0xff] %v1231_v5  ;;  %1679 = vrcp.f32 %v1175_v8 }
 0x3bf   :  { %v1674_v46 = vpop.eup %1673 }
 0x3c0   :  { %v1241_v12 = vmul.f32 %v1674_v46, %v2218_v31 }
 0x3c1   :  { %v1185_v33 = vpop.xlane.xlu0 %1184 }
 0x3c2   :  { %1298 = vst [vmem:[#allocation5 + $0x30] sm:$0xff] %v1241_v12  ;;  %1681 = vrcp.f32 %v1185_v33 }
 0x3c3   :  { %v1676_v18 = vpop.eup %1675 }
 0x3c4   :  { %v1678_v15 = vpop.eup %1677  ;;  %v1243_v62 = vmul.f32 %v1676_v18, %v2223_v39 }
 0x3c5   :  { %v1237_v35 = vmul.f32 %v1678_v15, %v2225_v40  ;;  %v1187_v13 = vpop.xlane.xlu1 %1186 }
 0x3c6   :  { %1299 = vst [vmem:[#allocation5 + $0x38] sm:$0xff] %v1243_v62  ;;  %1683 = vrcp.f32 %v1187_v13  ;;  %v1181_v51 = vpop.xlane.xlu0 %1180 }
 0x3c7   :  { %v1680_v27 = vpop.eup %1679  ;;  %1296 = vst [vmem:[#allocation5 + $0x20] sm:$0xff] %v1237_v35  ;;  %1685 = vrcp.f32 %v1181_v51 }
 0x3c8   :  { %v1239_v53 = vmul.f32 %v1680_v27, %v2230_v61 }
 0x3c9   :  { %v1183_v19 = vpop.xlane.xlu1 %1182 }
 0x3ca   :  { %1297 = vst [vmem:[#allocation5 + $0x28] sm:$0xff] %v1239_v53  ;;  %1687 = vrcp.f32 %v1183_v19 }
 0x3cf   :  { %v1682_v31 = vpop.eup %1681 }
 0x3d0   :  { %v1249_v25 = vmul.f32 %v1682_v31, %v2234_v55 }
 0x3d1   :  { %v1193_v28 = vpop.xlane.xlu0 %1192 }
 0x3d2   :  { %1302 = vst [vmem:[#allocation5 + $0x50] sm:$0xff] %v1249_v25  ;;  %1689 = vrcp.f32 %v1193_v28 }
 0x3d3   :  { %v1684_v39 = vpop.eup %1683 }
 0x3d4   :  { %v1686_v40 = vpop.eup %1685  ;;  %v1251_v17 = vmul.f32 %v1684_v39, %v2239_v2 }
 0x3d5   :  { %v1245_v58 = vmul.f32 %v1686_v40, %v2241_v3  ;;  %v1195_v41 = vpop.xlane.xlu1 %1194 }
 0x3d6   :  { %1303 = vst [vmem:[#allocation5 + $0x58] sm:$0xff] %v1251_v17  ;;  %1691 = vrcp.f32 %v1195_v41  ;;  %v1189_v20 = vpop.xlane.xlu0 %1188 }
 0x3d7   :  { %v1688_v61 = vpop.eup %1687  ;;  %1300 = vst [vmem:[#allocation5 + $0x40] sm:$0xff] %v1245_v58  ;;  %1693 = vrcp.f32 %v1189_v20 }
 0x3d8   :  { %v1247_v16 = vmul.f32 %v1688_v61, %v2246_v24 }
 0x3d9   :  { %v1191_v38 = vpop.xlane.xlu1 %1190 }
 0x3da   :  { %1301 = vst [vmem:[#allocation5 + $0x48] sm:$0xff] %v1247_v16  ;;  %1695 = vrcp.f32 %v1191_v38 }
 0x3df   :  { %v1690_v55 = vpop.eup %1689 }
 0x3e0   :  { %v1257_v48 = vmul.f32 %v1690_v55, %v2250_v50 }
 0x3e1   :  { %v1201_v23 = vpop.xlane.xlu0 %1200 }
 0x3e2   :  { %1306 = vst [vmem:[#allocation5 + $0x70] sm:$0xff] %v1257_v48  ;;  %1697 = vrcp.f32 %v1201_v23 }
 0x3e3   :  { %v1692_v2 = vpop.eup %1691 }
 0x3e4   :  { %v1694_v3 = vpop.eup %1693  ;;  %v1259_v42 = vmul.f32 %v1692_v2, %v2255_v22 }
 0x3e5   :  { %v1253_v49 = vmul.f32 %v1694_v3, %v2257_v56  ;;  %v1203_v4 = vpop.xlane.xlu1 %1202 }
 0x3e6   :  { %1307 = vst [vmem:[#allocation5 + $0x78] sm:$0xff] %v1259_v42  ;;  %1699 = vrcp.f32 %v1203_v4  ;;  %v1197_v26 = vpop.xlane.xlu0 %1196 }
 0x3e7   :  { %v1696_v24 = vpop.eup %1695  ;;  %1304 = vst [vmem:[#allocation5 + $0x60] sm:$0xff] %v1253_v49  ;;  %1701 = vrcp.f32 %v1197_v26 }
 0x3e8   :  { %v1255_v10 = vmul.f32 %v1696_v24, %v2262_v43 }
 0x3e9   :  { %v1199_v30 = vpop.xlane.xlu1 %1198 }
 0x3ea   :  { %1305 = vst [vmem:[#allocation5 + $0x68] sm:$0xff] %v1255_v10  ;;  %1703 = vrcp.f32 %v1199_v30 }
 0x3ef   :  { %v1698_v50 = vpop.eup %1697 }
 0x3f0   :  { %v1265_v29 = vmul.f32 %v1698_v50, %v2266_v34 }
 0x3f1   :  { %v1209_v9 = vpop.xlane.xlu0 %1208 }
 0x3f2   :  { %1310 = vst [vmem:[#allocation5 + $0x90] sm:$0xff] %v1265_v29  ;;  %1705 = vrcp.f32 %v1209_v9 }
 0x3f3   :  { %v1700_v22 = vpop.eup %1699 }
 0x3f4   :  { %v1702_v56 = vpop.eup %1701  ;;  %v1267_v59 = vmul.f32 %v1700_v22, %v2271_v44 }
 0x3f5   :  { %v1261_v6 = vmul.f32 %v1702_v56, %v2273_v1  ;;  %v1211_v63 = vpop.xlane.xlu1 %1210 }
 0x3f6   :  { %1311 = vst [vmem:[#allocation5 + $0x98] sm:$0xff] %v1267_v59  ;;  %1707 = vrcp.f32 %v1211_v63  ;;  %v1205_v32 = vpop.xlane.xlu0 %1204 }
 0x3f7   :  { %v1704_v43 = vpop.eup %1703  ;;  %1308 = vst [vmem:[#allocation5 + $0x80] sm:$0xff] %v1261_v6  ;;  %1709 = vrcp.f32 %v1205_v32 }
 0x3f8   :  { %v1263_v5 = vmul.f32 %v1704_v43, %v2278_v52 }
 0x3f9   :  { %v1207_v8 = vpop.xlane.xlu1 %1206 }
 0x3fa   :  { %1309 = vst [vmem:[#allocation5 + $0x88] sm:$0xff] %v1263_v5  ;;  %1711 = vrcp.f32 %v1207_v8 }
 0x3ff   :  { %v1706_v34 = vpop.eup %1705 }
 0x400   :  { %v1273_v46 = vmul.f32 %v1706_v34, %v2282_v57 }
 0x401   :  { %v1217_v12 = vpop.xlane.xlu0 %1216 }
 0x402   :  { %1314 = vst [vmem:[#allocation5 + $0xb0] sm:$0xff] %v1273_v46  ;;  %1713 = vrcp.f32 %v1217_v12 }
 0x403   :  { %v1708_v44 = vpop.eup %1707 }
 0x404   :  { %v1710_v1 = vpop.eup %1709  ;;  %v1275_v33 = vmul.f32 %v1708_v44, %v2287_v7 }
 0x405   :  { %v1269_v18 = vmul.f32 %v1710_v1, %v2289_v0  ;;  %v1219_v15 = vpop.xlane.xlu1 %1218 }
 0x406   :  { %1315 = vst [vmem:[#allocation5 + $0xb8] sm:$0xff] %v1275_v33  ;;  %1715 = vrcp.f32 %v1219_v15  ;;  %v1213_v62 = vpop.xlane.xlu0 %1212 }
 0x407   :  { %v1712_v52 = vpop.eup %1711  ;;  %1312 = vst [vmem:[#allocation5 + $0xa0] sm:$0xff] %v1269_v18  ;;  %1717 = vrcp.f32 %v1213_v62 }
 0x408   :  { %v1271_v35 = vmul.f32 %v1712_v52, %v2294_v11 }
 0x409   :  { %v1215_v13 = vpop.xlane.xlu1 %1214 }
 0x40a   :  { %1313 = vst [vmem:[#allocation5 + $0xa8] sm:$0xff] %v1271_v35  ;;  %1719 = vrcp.f32 %v1215_v13 }
 0x40f   :  { %v1714_v57 = vpop.eup %1713 }
 0x410   :  { %v1281_v51 = vmul.f32 %v1714_v57, %v2297_v54 }
 0x412   :  { %1318 = vst [vmem:[#allocation5 + $0xd0] sm:$0xff] %v1281_v51 }
 0x413   :  { %v1716_v27 = vpop.eup %1715  ;;  %v1221_v7 = vpop.xlane.xlu0 %1220 }
 0x414   :  { %v1718_v53 = vpop.eup %1717  ;;  %v1283_v0 = vmul.f32 %v1716_v27, %v2301_v14  ;;  %1721 = vrcp.f32 %v1221_v7 }
 0x415   :  { %v1277_v19 = vmul.f32 %v1718_v53, %v2303_v37 }
 0x416   :  { %1319 = vst [vmem:[#allocation5 + $0xd8] sm:$0xff] %v1283_v0 }
 0x417   :  { %v1720_v31 = vpop.eup %1719  ;;  %1316 = vst [vmem:[#allocation5 + $0xc0] sm:$0xff] %v1277_v19  ;;  %v1223_v25 = vpop.xlane.xlu1 %1222 }
 0x418   :  { %v1279_v11 = vmul.f32 %v1720_v31, %v2309_v21  ;;  %1723 = vrcp.f32 %v1223_v25  ;;  %v1225_v28 = vpop.xlane.xlu0 %1224 }
 0x419   :  { %1725 = vrcp.f32 %v1225_v28 }
 0x41a   :  { %1317 = vst [vmem:[#allocation5 + $0xc8] sm:$0xff] %v1279_v11 }
 0x41b   :  { %v1227_v54 = vpop.xlane.xlu1 %1226 }
 0x41c   :  { %1727 = vrcp.f32 %v1227_v54 }
 0x421   :  { %v1722_v39 = vpop.eup %1721 }
 0x422   :  { %v1285_v40 = vmul.f32 %v1722_v39, %v2313_v47 }
 0x424   :  { %1320 = vst [vmem:[#allocation5 + $0xe0] sm:$0xff] %v1285_v40 }
 0x425   :  { %v1724_v14 = vpop.eup %1723 }
 0x426   :  { %v1726_v17 = vpop.eup %1725  ;;  %v1287_v37 = vmul.f32 %v1724_v14, %v2316_v45 }
 0x427   :  { %v1289_v58 = vmul.f32 %v1726_v17, %v2318_v60 }
 0x428   :  { %1321 = vst [vmem:[#allocation5 + $0xe8] sm:$0xff] %v1287_v37 }
 0x429   :  { %v1728_v21 = vpop.eup %1727  ;;  %1322 = vst [vmem:[#allocation5 + $0xf0] sm:$0xff] %v1289_v58 }
 0x42a   :  { %v1291_v41 = vmul.f32 %v1728_v21, %v2322_v36 }
 0x42c   :  { %1323 = vst [vmem:[#allocation5 + $0xf8] sm:$0xff] %v1291_v41 }
 0x42d   :  { %1760 = shalt.err (!%p1757_p9)
}
 0x42e   :  { %1335 = dma.vmem_to_hbm [thread:$0]  %s1330_s8, 4096, %s2366_s3, [#allocation4], %s1774_s15, %s1774_s15, %s1775_s16  }
 0x42f   :  { %1771 = dma.done.wait [#allocation4], 4096  }
 0x430   :  { %1772 = vsyncadd [#allocation4], 4294963200 }
 0x431   :  { %1339 = vsyncpa [#allocation3], 1 }
 0x432   :  { %1340 = vsyncpa [#allocation4], 1 }

</bundles_post_ra>
